<compile_context>
chip_gen: v7x
topology: tpu7x:2x2x1
jax: 0.10.0
libtpu: 0.0.40
codegen_flags: <defaults>
</compile_context>

<pallas_src>
import functools

import jax
import jax.numpy as jnp
from jax.experimental import pallas as pl
from jax.experimental.pallas import tpu as pltpu


# ----------------------------------------------------------------------------
# Fused TransformerBlock kernel
# ----------------------------------------------------------------------------

def _layernorm_f32(a, gamma, beta, eps=1e-5):
    """torch.nn.LayerNorm over the last dim, f32 statistics."""
    mean = jnp.mean(a, axis=-1, keepdims=True)
    var = jnp.mean(jnp.square(a - mean), axis=-1, keepdims=True)
    return (a - mean) * jax.lax.rsqrt(var + eps) * gamma + beta


def _transformer_block_kernel(
        q_ref, k_ref, v_ref, kv_ref,                 # activations + key-valid
        wq_ref, wk_ref, wv_ref, wo_ref,              # attention weights (bf16)
        vec_ref,                                     # packed (8,E): bo,g1,b1n,b2,g2,b2n
        w1_ref, b1_ref, w2_ref,                      # feed-forward weights
        o_ref,                                       # output
        qp_sc, m_sc, l_sc, acc_sc,                   # VMEM scratch
        *, heads, head_dim, embed_size):
    f32 = jnp.float32
    bf16 = jnp.bfloat16
    kv_step = pl.program_id(2)
    num_kv = pl.num_programs(2)
    # torch: energy.masked_fill(mask==0, -1e20) then / sqrt(E).  The 1/sqrt(E)
    # is folded into Wq in glue, so the exact fill value is -1e20/sqrt(E).
    neg_fill = f32(-1e20 / (embed_size ** 0.5))

    # ---- per-(batch, q-tile) init: project Q once (scale folded into wq_bd),
    # reset the online-softmax state.
    @pl.when(kv_step == 0)
    def _init():
        qp = jnp.dot(q_ref[0].astype(bf16), wq_ref[...],
                     preferred_element_type=f32)               # (TQ, E)
        for h in range(heads):
            qp_sc[h] = qp[:, h * head_dim:(h + 1) * head_dim].astype(bf16)
        m_sc[...] = jnp.full(m_sc.shape, -jnp.inf, f32)
        l_sc[...] = jnp.zeros(l_sc.shape, f32)
        acc_sc[...] = jnp.zeros(acc_sc.shape, f32)

    # ---- this KV chunk: one (TKV,E)@(E,E) bf16 MXU matmul each for K and V
    # (block-diagonal weights == same per-head Linear applied to every head).
    kp = jnp.dot(k_ref[0], wk_ref[...], preferred_element_type=f32).astype(bf16)
    vp = jnp.dot(v_ref[0], wv_ref[...], preferred_element_type=f32).astype(bf16)
    key_masked = (kv_ref[0] == 0)                              # (1, TKV), hoisted

    # Static head unroll (heads is small here).
    # TODO(synk): switch to lax.fori_loop + pl.ds head slices for heads >> 4
    # to bound live ranges of the (TQ, TKV) temporaries.
    for h in range(heads):
        sl = slice(h * head_dim, (h + 1) * head_dim)
        s = jax.lax.dot_general(                               # Q . K^T -> (TQ, TKV)
            qp_sc[h], kp[:, sl],
            dimension_numbers=(((1,), (1,)), ((), ())),
            preferred_element_type=f32)
        s = jnp.where(key_masked, neg_fill, s)                 # exact torch fill
        m_prev = m_sc[h]                                       # (TQ, 1)
        m_new = jnp.maximum(m_prev, jnp.max(s, axis=-1, keepdims=True))
        alpha = jnp.exp(m_prev - m_new)                        # 0 on first chunk
        p = jnp.exp(s - m_new)
        l_sc[h] = alpha * l_sc[h] + jnp.sum(p, axis=-1, keepdims=True)
        acc_sc[h] = alpha * acc_sc[h] + jnp.dot(
            p.astype(bf16), vp[:, sl], preferred_element_type=f32)
        m_sc[h] = m_new

    # ---- finalize on the last KV chunk: normalize, single full-depth output
    # projection, residual + LayerNorm, FFN, residual + LayerNorm.
    @pl.when(kv_step == num_kv - 1)
    def _finalize():
        ctx = jnp.concatenate(
            [acc_sc[h] * pl.reciprocal(l_sc[h], approx=True)   # EUP reciprocal
             for h in range(heads)], axis=-1)                  # (TQ, E) f32
        bo, g1, be1, b2, g2, be2 = (vec_ref[i:i + 1] for i in range(6))
        attn = jnp.dot(ctx.astype(bf16), wo_ref[...],
                       preferred_element_type=f32) + bo        # fc_out
        q = q_ref[0]                                           # f32 residual
        x1 = q + _layernorm_f32(attn, g1, be1)
        # TODO(synk): chunk the Eh axis (loop + accumulate) for v7x when
        # forward_expansion * E gets large.
        h1 = jnp.maximum(
            jnp.dot(x1.astype(bf16), w1_ref[...],
                    preferred_element_type=f32) + b1_ref[...], 0.0)
        ff = jnp.dot(h1.astype(bf16), w2_ref[...],
                     preferred_element_type=f32) + b2
        o_ref[0] = (x1 + _layernorm_f32(ff, g2, be2)).astype(o_ref.dtype)


# ----------------------------------------------------------------------------
# Wrapper: one pallas_call for the whole TransformerBlock
# ----------------------------------------------------------------------------

def _prep_key_valid(mask, N, Lk):
    """Padding-style mask -> (N, 1, Lk) int32 key-valid vector."""
    if mask is None:
        return jnp.ones((N, 1, Lk), jnp.int32)
    # Only masks broadcastable over heads and query positions (padding masks)
    # are supported; broadcast_to raises otherwise.
    # TODO(synk): general (N, H, Lq, Lk) masks need a (q_tile, kv_tile) operand.
    m = jnp.broadcast_to(jnp.asarray(mask), (N, 1, 1, Lk))
    return (m[:, 0] != 0).astype(jnp.int32)                    # (N, 1, Lk)


def _pick_tile(length, cap):
    """Largest divisor of `length` that is <= cap."""
    if length <= cap:
        return length
    for cand in range(cap, 0, -1):
        if length % cand == 0:
            return cand
    return length


def _vmem_limit_bytes():
    """~3/4 of per-core VMEM (≈96 MiB v5e/v6e, ≈48 MiB v7x); None if unknown."""
    try:
        return int(pltpu.get_tpu_info().vmem_capacity_bytes * 3 // 4)
    except Exception:
        return None


def pallas_transformer_block(value, key, query, mask, prep, heads,
                             *, q_tile=None, kv_tile=None):
    """TransformerBlock.forward(value, key, query, mask) as one fused kernel."""
    N, Lq, E = query.shape
    Lk = key.shape[1]
    assert E % heads == 0
    hd = E // heads
    Eh = prep['w1_t'].shape[1]

    # Tile defaults: up to 256-row query tiles amortize per-grid-step overhead
    # on v5e/v6e (128 MiB VMEM); pass q_tile=128 explicitly on v7x (64 MiB).
    q_tile = q_tile or _pick_tile(Lq, 256)
    kv_tile = kv_tile or _pick_tile(Lk, 512)
    assert Lq % q_tile == 0 and Lk % kv_tile == 0
    grid = (N, Lq // q_tile, Lk // kv_tile)

    key_valid = _prep_key_valid(mask, N, Lk)                   # (N, 1, Lk) int32
    key_bf = key.astype(jnp.bfloat16)                          # MXU-only -> bf16 DMA
    value_bf = value.astype(jnp.bfloat16)

    def wspec(shape):                                          # loop-invariant operand
        return pl.BlockSpec(shape, lambda b, t, kv: (0, 0))

    kernel = functools.partial(_transformer_block_kernel,
                               heads=heads, head_dim=hd, embed_size=E)
    return pl.pallas_call(
        kernel,
        out_shape=jax.ShapeDtypeStruct((N, Lq, E), jnp.float32),
        grid=grid,
        in_specs=[
            pl.BlockSpec((1, q_tile, E), lambda b, t, kv: (b, t, 0)),    # Q tile (f32)
            pl.BlockSpec((1, kv_tile, E), lambda b, t, kv: (b, kv, 0)),  # K chunk (bf16)
            pl.BlockSpec((1, kv_tile, E), lambda b, t, kv: (b, kv, 0)),  # V chunk (bf16)
            pl.BlockSpec((1, 1, kv_tile), lambda b, t, kv: (b, 0, kv)),  # key-valid chunk
            wspec((E, E)), wspec((E, E)), wspec((E, E)), wspec((E, E)),  # Wq/Wk/Wv/Wo
            wspec((8, E)),                                               # packed vectors
            wspec((E, Eh)), wspec((1, Eh)), wspec((Eh, E)),              # W1^T, b1, W2^T
        ],
        out_specs=pl.BlockSpec((1, q_tile, E), lambda b, t, kv: (b, t, 0)),
        scratch_shapes=[
            pltpu.VMEM((heads, q_tile, hd), jnp.bfloat16),   # cached Q projection
            pltpu.VMEM((heads, q_tile, 1), jnp.float32),     # online-softmax max
            pltpu.VMEM((heads, q_tile, 1), jnp.float32),     # online-softmax sum
            pltpu.VMEM((heads, q_tile, hd), jnp.float32),    # context accumulator
        ],
        compiler_params=pltpu.CompilerParams(
            dimension_semantics=("parallel", "parallel", "arbitrary"),
            vmem_limit_bytes=_vmem_limit_bytes()),
    )(query, key_bf, value_bf, key_valid,
      prep['wq_bd'], prep['wk_bd'], prep['wv_bd'], prep['wo_t'],
      prep['vecs'],
      prep['w1_t'], prep['b1'], prep['w2_t'])


# ----------------------------------------------------------------------------
# Parameter init (PyTorch-style layout) and kernel-side preparation
# ----------------------------------------------------------------------------

def init_transformer_block_params(key, E, heads, forward_expansion, scale=0.1):
    hd = E // heads
    Eh = forward_expansion * E
    ks = jax.random.split(key, 12)
    return {
        'attn': {
            'wq': jax.random.normal(ks[0], (hd, hd), jnp.float32) * scale,
            'wk': jax.random.normal(ks[1], (hd, hd), jnp.float32) * scale,
            'wv': jax.random.normal(ks[2], (hd, hd), jnp.float32) * scale,
            'wo': jax.random.normal(ks[3], (E, E), jnp.float32) * scale,
            'bo': jax.random.normal(ks[4], (E,), jnp.float32) * scale,
        },
        'norm1': {'gamma': 1.0 + jax.random.normal(ks[5], (E,), jnp.float32) * scale,
                  'beta': jax.random.normal(ks[6], (E,), jnp.float32) * scale},
        'norm2': {'gamma': 1.0 + jax.random.normal(ks[7], (E,), jnp.float32) * scale,
                  'beta': jax.random.normal(ks[8], (E,), jnp.float32) * scale},
        'ffn': {
            'w1': jax.random.normal(ks[9], (Eh, E), jnp.float32) * scale,
            'b1': jax.random.normal(ks[10], (Eh,), jnp.float32) * scale,
            'w2': jax.random.normal(ks[11], (E, Eh), jnp.float32) * scale,
            'b2': jnp.zeros((E,), jnp.float32),
        },
    }


def prepare_block_params(params, heads):
    """PyTorch (out,in) weights -> kernel layout (block-diag / transposed bf16,
    1/sqrt(E) folded into Wq, bias/LayerNorm vectors packed into one (8,E))."""
    a, f = params['attn'], params['ffn']
    E = a['wo'].shape[0]
    eye = jnp.eye(heads, dtype=jnp.float32)
    inv_scale = 1.0 / (E ** 0.5)

    def blockdiag(w, scale=1.0):   # (hd,hd) (out,in) -> (E,E) (in,out), same block/head
        return (jnp.kron(eye, w.T) * scale).astype(jnp.bfloat16)

    def row(x):
        return jnp.asarray(x, jnp.float32).reshape(1, -1)

    vecs = jnp.concatenate([
        row(a['bo']),
        row(params['norm1']['gamma']), row(params['norm1']['beta']),
        row(f['b2']),
        row(params['norm2']['gamma']), row(params['norm2']['beta']),
        jnp.zeros((2, E), jnp.float32),                       # pad to 8 sublanes
    ], axis=0)

    return {
        'wq_bd': blockdiag(a['wq'], inv_scale),               # scale folded in
        'wk_bd': blockdiag(a['wk']),
        'wv_bd': blockdiag(a['wv']),
        'wo_t': a['wo'].T.astype(jnp.bfloat16),
        'vecs': vecs,
        'w1_t': f['w1'].T.astype(jnp.bfloat16),
        'b1': row(f['b1']),
        'w2_t': f['w2'].T.astype(jnp.bfloat16),
    }


# ----------------------------------------------------------------------------
# Pure-JAX f32 reference (mirrors the PyTorch module) for correctness checking
# ----------------------------------------------------------------------------

def _ref_self_attention(values, keys, queries, mask, p, heads):
    N, Lq, E = queries.shape
    Lk = keys.shape[1]
    hd = E // heads
    v = jnp.einsum('nlhd,ed->nlhe', values.reshape(N, Lk, heads, hd), p['wv'])
    k = jnp.einsum('nlhd,ed->nlhe', keys.reshape(N, Lk, heads, hd), p['wk'])
    q = jnp.einsum('nqhd,ed->nqhe', queries.reshape(N, Lq, heads, hd), p['wq'])
    energy = jnp.einsum('nqhd,nkhd->nhqk', q, k)
    if mask is not None:
        energy = jnp.where(mask == 0, -1e20, energy)
    attn = jax.nn.softmax(energy / (E ** 0.5), axis=3)
    out = jnp.einsum('nhql,nlhd->nqhd', attn, v).reshape(N, Lq, E)
    return out @ p['wo'].T + p['bo']


def _ref_layernorm(a, p, eps=1e-5):
    mean = jnp.mean(a, axis=-1, keepdims=True)
    var = jnp.mean(jnp.square(a - mean), axis=-1, keepdims=True)
    return (a - mean) / jnp.sqrt(var + eps) * p['gamma'] + p['beta']


def ref_transformer_block(params, value, key, query, mask, heads):
    attn = _ref_self_attention(value, key, query, mask, params['attn'], heads)
    x = query + _ref_layernorm(attn, params['norm1'])
    h = jnp.maximum(x @ params['ffn']['w1'].T + params['ffn']['b1'], 0.0)
    ff = h @ params['ffn']['w2'].T + params['ffn']['b2']
    return x + _ref_layernorm(ff, params['norm2'])


# ----------------------------------------------------------------------------

if __name__ == "__main__":
    root = jax.random.PRNGKey(0)
    N, Lq, Lk = 2, 8, 16          # batch, query length, key/value length
    E, H, FE = 128, 4, 2          # embed size (lane-dense), heads, fwd expansion

    k_q, k_kv, k_par = jax.random.split(root, 3)
    query = jax.random.normal(k_q, (N, Lq, E), jnp.float32)
    kv = jax.random.normal(k_kv, (N, Lk, E), jnp.float32)

    # Padding-style mask (N,1,1,Lk): batch 0 sees all keys, batch 1 masks last 4.
    key_ok = jnp.arange(Lk)[None, :] < jnp.array([[Lk], [Lk - 4]])
    mask = key_ok.astype(jnp.float32)[:, None, None, :]

    params = init_transformer_block_params(k_par, E, H, FE)
    prep = prepare_block_params(params, H)

    out = pallas_transformer_block(kv, kv, query, mask, prep, H)
    out = jax.block_until_ready(out)
    assert out.shape == (N, Lq, E), out.shape

    ref = jax.block_until_ready(
        ref_transformer_block(params, kv, kv, query, mask, H))
    err = float(jnp.max(jnp.abs(out - ref)))
    # bf16 MXU operands (f32 accumulation) vs an f32 reference -> small deviation.
    assert jnp.allclose(out, ref, atol=7.5e-2, rtol=5e-2), f"max abs err = {err}"
    print("KERNEL_OK")
</pallas_src>

<mosaic_0001>
module attributes {stable_mosaic.version = 11 : i64} {
  func.func @_transformer_block_kernel(%arg0: i32, %arg1: i32, %arg2: i32, %arg3: memref<1x8x128xf32, #tpu.memory_space<vmem>>, %arg4: memref<1x16x128xbf16, #tpu.memory_space<vmem>>, %arg5: memref<1x16x128xbf16, #tpu.memory_space<vmem>>, %arg6: memref<1x1x16xi32, #tpu.memory_space<vmem>>, %arg7: memref<128x128xbf16, #tpu.memory_space<vmem>>, %arg8: memref<128x128xbf16, #tpu.memory_space<vmem>>, %arg9: memref<128x128xbf16, #tpu.memory_space<vmem>>, %arg10: memref<128x128xbf16, #tpu.memory_space<vmem>>, %arg11: memref<8x128xf32, #tpu.memory_space<vmem>>, %arg12: memref<128x256xbf16, #tpu.memory_space<vmem>>, %arg13: memref<1x256xf32, #tpu.memory_space<vmem>>, %arg14: memref<256x128xbf16, #tpu.memory_space<vmem>>, %arg15: memref<1x8x128xf32, #tpu.memory_space<vmem>>, %arg16: memref<4x8x32xbf16, #tpu.memory_space<vmem>>, %arg17: memref<4x8x1xf32, #tpu.memory_space<vmem>>, %arg18: memref<4x8x1xf32, #tpu.memory_space<vmem>>, %arg19: memref<4x8x32xf32, #tpu.memory_space<vmem>>) attributes {dimension_semantics = [#tpu.dimension_semantics<parallel>, #tpu.dimension_semantics<parallel>, #tpu.dimension_semantics<arbitrary>], iteration_bounds = array<i64: 2, 1, 1>, scalar_prefetch = 0 : i64, scratch_operands = 4 : i64, tpu.core_type = #tpu.core_type<tc>, window_params = [{transform_indices = @transform_0, window_bounds = array<i64: 1, 8, 128>}, {transform_indices = @transform_1, window_bounds = array<i64: 1, 16, 128>}, {transform_indices = @transform_2, window_bounds = array<i64: 1, 16, 128>}, {transform_indices = @transform_3, window_bounds = array<i64: 1, 1, 16>}, {pipeline_mode = #tpu.pipeline_mode<synchronous>, transform_indices = @transform_4, window_bounds = array<i64: 128, 128>}, {pipeline_mode = #tpu.pipeline_mode<synchronous>, transform_indices = @transform_5, window_bounds = array<i64: 128, 128>}, {pipeline_mode = #tpu.pipeline_mode<synchronous>, transform_indices = @transform_6, window_bounds = array<i64: 128, 128>}, {pipeline_mode = #tpu.pipeline_mode<synchronous>, transform_indices = @transform_7, window_bounds = array<i64: 128, 128>}, {pipeline_mode = #tpu.pipeline_mode<synchronous>, transform_indices = @transform_8, window_bounds = array<i64: 8, 128>}, {pipeline_mode = #tpu.pipeline_mode<synchronous>, transform_indices = @transform_9, window_bounds = array<i64: 128, 256>}, {pipeline_mode = #tpu.pipeline_mode<synchronous>, transform_indices = @transform_10, window_bounds = array<i64: 1, 256>}, {pipeline_mode = #tpu.pipeline_mode<synchronous>, transform_indices = @transform_11, window_bounds = array<i64: 256, 128>}, {transform_indices = @transform_12, window_bounds = array<i64: 1, 8, 128>}]} {
    %c0_i32 = arith.constant 0 : i32
    %0 = arith.cmpi eq, %arg2, %c0_i32 : i32
    %1 = arith.extui %0 : i1 to i32
    %c0_i32_0 = arith.constant 0 : i32
    %2 = arith.cmpi ne, %1, %c0_i32_0 : i32
    scf.if %2 {
      %c0_118 = arith.constant 0 : index
      %c0_119 = arith.constant 0 : index
      %c0_120 = arith.constant 0 : index
      %184 = vector.load %arg3[%c0_118, %c0_119, %c0_120] : memref<1x8x128xf32, #tpu.memory_space<vmem>>, vector<1x8x128xf32>
      %185 = vector.shape_cast %184 : vector<1x8x128xf32> to vector<8x128xf32>
      %186 = arith.truncf %185 : vector<8x128xf32> to vector<8x128xbf16>
      %c0_121 = arith.constant 0 : index
      %c0_122 = arith.constant 0 : index
      %187 = vector.load %arg7[%c0_121, %c0_122] : memref<128x128xbf16, #tpu.memory_space<vmem>>, vector<128x128xbf16>
      %cst_123 = arith.constant dense<0.000000e+00> : vector<8x128xf32>
      %188 = tpu.matmul %186, %187, %cst_123 {dimension_numbers = #tpu.dot_dimension_numbers<[1], [0], [0], [1], [0, 0, 1, 1], [], []>} : vector<8x128xbf16>, vector<128x128xbf16>, vector<8x128xf32> -> vector<8x128xf32>
      %189 = vector.extract_strided_slice %188 {offsets = [0, 0], sizes = [8, 32], strides = [1, 1]} : vector<8x128xf32> to vector<8x32xf32>
      %190 = arith.truncf %189 : vector<8x32xf32> to vector<8x32xbf16>
      %c0_124 = arith.constant 0 : index
      %c0_125 = arith.constant 0 : index
      %c0_126 = arith.constant 0 : index
      %191 = vector.load %arg16[%c0_124, %c0_125, %c0_126] : memref<4x8x32xbf16, #tpu.memory_space<vmem>>, vector<1x8x32xbf16>
      %192 = vector.shape_cast %191 : vector<1x8x32xbf16> to vector<8x32xbf16>
      %193 = vector.shape_cast %190 : vector<8x32xbf16> to vector<1x8x32xbf16>
      tpu.vector_store %arg16[%c0_124, %c0_125, %c0_126], %193 {strides = array<i32>} : memref<4x8x32xbf16, #tpu.memory_space<vmem>>, vector<1x8x32xbf16>,
      %194 = vector.extract_strided_slice %188 {offsets = [0, 32], sizes = [8, 32], strides = [1, 1]} : vector<8x128xf32> to vector<8x32xf32>
      %195 = arith.truncf %194 : vector<8x32xf32> to vector<8x32xbf16>
      %c1_127 = arith.constant 1 : index
      %c0_128 = arith.constant 0 : index
      %c0_129 = arith.constant 0 : index
      %196 = vector.load %arg16[%c1_127, %c0_128, %c0_129] : memref<4x8x32xbf16, #tpu.memory_space<vmem>>, vector<1x8x32xbf16>
      %197 = vector.shape_cast %196 : vector<1x8x32xbf16> to vector<8x32xbf16>
      %198 = vector.shape_cast %195 : vector<8x32xbf16> to vector<1x8x32xbf16>
      tpu.vector_store %arg16[%c1_127, %c0_128, %c0_129], %198 {strides = array<i32>} : memref<4x8x32xbf16, #tpu.memory_space<vmem>>, vector<1x8x32xbf16>,
      %199 = vector.extract_strided_slice %188 {offsets = [0, 64], sizes = [8, 32], strides = [1, 1]} : vector<8x128xf32> to vector<8x32xf32>
      %200 = arith.truncf %199 : vector<8x32xf32> to vector<8x32xbf16>
      %c2_130 = arith.constant 2 : index
      %c0_131 = arith.constant 0 : index
      %c0_132 = arith.constant 0 : index
      %201 = vector.load %arg16[%c2_130, %c0_131, %c0_132] : memref<4x8x32xbf16, #tpu.memory_space<vmem>>, vector<1x8x32xbf16>
      %202 = vector.shape_cast %201 : vector<1x8x32xbf16> to vector<8x32xbf16>
      %203 = vector.shape_cast %200 : vector<8x32xbf16> to vector<1x8x32xbf16>
      tpu.vector_store %arg16[%c2_130, %c0_131, %c0_132], %203 {strides = array<i32>} : memref<4x8x32xbf16, #tpu.memory_space<vmem>>, vector<1x8x32xbf16>,
      %204 = vector.extract_strided_slice %188 {offsets = [0, 96], sizes = [8, 32], strides = [1, 1]} : vector<8x128xf32> to vector<8x32xf32>
      %205 = arith.truncf %204 : vector<8x32xf32> to vector<8x32xbf16>
      %c3_133 = arith.constant 3 : index
      %c0_134 = arith.constant 0 : index
      %c0_135 = arith.constant 0 : index
      %206 = vector.load %arg16[%c3_133, %c0_134, %c0_135] : memref<4x8x32xbf16, #tpu.memory_space<vmem>>, vector<1x8x32xbf16>
      %207 = vector.shape_cast %206 : vector<1x8x32xbf16> to vector<8x32xbf16>
      %208 = vector.shape_cast %205 : vector<8x32xbf16> to vector<1x8x32xbf16>
      tpu.vector_store %arg16[%c3_133, %c0_134, %c0_135], %208 {strides = array<i32>} : memref<4x8x32xbf16, #tpu.memory_space<vmem>>, vector<1x8x32xbf16>,
      %cst_136 = arith.constant 0xFF800000 : f32
      %209 = vector.broadcast %cst_136 : f32 to vector<4x8x1xf32>
      %c0_137 = arith.constant 0 : index
      %c0_138 = arith.constant 0 : index
      %c0_139 = arith.constant 0 : index
      %210 = vector.load %arg17[%c0_137, %c0_138, %c0_139] : memref<4x8x1xf32, #tpu.memory_space<vmem>>, vector<4x8x1xf32>
      tpu.vector_store %arg17[%c0_137, %c0_138, %c0_139], %209 {strides = array<i32>} : memref<4x8x1xf32, #tpu.memory_space<vmem>>, vector<4x8x1xf32>,
      %cst_140 = arith.constant 0.000000e+00 : f32
      %211 = vector.broadcast %cst_140 : f32 to vector<4x8x1xf32>
      %c0_141 = arith.constant 0 : index
      %c0_142 = arith.constant 0 : index
      %c0_143 = arith.constant 0 : index
      %212 = vector.load %arg18[%c0_141, %c0_142, %c0_143] : memref<4x8x1xf32, #tpu.memory_space<vmem>>, vector<4x8x1xf32>
      tpu.vector_store %arg18[%c0_141, %c0_142, %c0_143], %211 {strides = array<i32>} : memref<4x8x1xf32, #tpu.memory_space<vmem>>, vector<4x8x1xf32>,
      %cst_144 = arith.constant 0.000000e+00 : f32
      %213 = vector.broadcast %cst_144 : f32 to vector<4x8x32xf32>
      %c0_145 = arith.constant 0 : index
      %c0_146 = arith.constant 0 : index
      %c0_147 = arith.constant 0 : index
      %214 = vector.load %arg19[%c0_145, %c0_146, %c0_147] : memref<4x8x32xf32, #tpu.memory_space<vmem>>, vector<4x8x32xf32>
      tpu.vector_store %arg19[%c0_145, %c0_146, %c0_147], %213 {strides = array<i32>} : memref<4x8x32xf32, #tpu.memory_space<vmem>>, vector<4x8x32xf32>,
    } else {
    }
    %c0 = arith.constant 0 : index
    %c0_1 = arith.constant 0 : index
    %c0_2 = arith.constant 0 : index
    %3 = vector.load %arg4[%c0, %c0_1, %c0_2] : memref<1x16x128xbf16, #tpu.memory_space<vmem>>, vector<1x16x128xbf16>
    %4 = vector.shape_cast %3 : vector<1x16x128xbf16> to vector<16x128xbf16>
    %c0_3 = arith.constant 0 : index
    %c0_4 = arith.constant 0 : index
    %5 = vector.load %arg8[%c0_3, %c0_4] : memref<128x128xbf16, #tpu.memory_space<vmem>>, vector<128x128xbf16>
    %cst = arith.constant dense<0.000000e+00> : vector<16x128xf32>
    %6 = tpu.matmul %4, %5, %cst {dimension_numbers = #tpu.dot_dimension_numbers<[1], [0], [0], [1], [0, 0, 1, 1], [], []>} : vector<16x128xbf16>, vector<128x128xbf16>, vector<16x128xf32> -> vector<16x128xf32>
    %7 = arith.truncf %6 : vector<16x128xf32> to vector<16x128xbf16>
    %c0_5 = arith.constant 0 : index
    %c0_6 = arith.constant 0 : index
    %c0_7 = arith.constant 0 : index
    %8 = vector.load %arg5[%c0_5, %c0_6, %c0_7] : memref<1x16x128xbf16, #tpu.memory_space<vmem>>, vector<1x16x128xbf16>
    %9 = vector.shape_cast %8 : vector<1x16x128xbf16> to vector<16x128xbf16>
    %c0_8 = arith.constant 0 : index
    %c0_9 = arith.constant 0 : index
    %10 = vector.load %arg9[%c0_8, %c0_9] : memref<128x128xbf16, #tpu.memory_space<vmem>>, vector<128x128xbf16>
    %cst_10 = arith.constant dense<0.000000e+00> : vector<16x128xf32>
    %11 = tpu.matmul %9, %10, %cst_10 {dimension_numbers = #tpu.dot_dimension_numbers<[1], [0], [0], [1], [0, 0, 1, 1], [], []>} : vector<16x128xbf16>, vector<128x128xbf16>, vector<16x128xf32> -> vector<16x128xf32>
    %12 = arith.truncf %11 : vector<16x128xf32> to vector<16x128xbf16>
    %c0_11 = arith.constant 0 : index
    %c0_12 = arith.constant 0 : index
    %c0_13 = arith.constant 0 : index
    %13 = vector.load %arg6[%c0_11, %c0_12, %c0_13] : memref<1x1x16xi32, #tpu.memory_space<vmem>>, vector<1x1x16xi32>
    %14 = vector.shape_cast %13 : vector<1x1x16xi32> to vector<1x16xi32>
    %c0_i32_14 = arith.constant 0 : i32
    %15 = vector.broadcast %c0_i32_14 : i32 to vector<1x16xi32>
    %16 = arith.cmpi eq, %14, %15 : vector<1x16xi32>
    %c0_15 = arith.constant 0 : index
    %c0_16 = arith.constant 0 : index
    %c0_17 = arith.constant 0 : index
    %17 = vector.load %arg16[%c0_15, %c0_16, %c0_17] : memref<4x8x32xbf16, #tpu.memory_space<vmem>>, vector<1x8x32xbf16>
    %18 = vector.shape_cast %17 : vector<1x8x32xbf16> to vector<8x32xbf16>
    %19 = vector.extract_strided_slice %7 {offsets = [0, 0], sizes = [16, 32], strides = [1, 1]} : vector<16x128xbf16> to vector<16x32xbf16>
    %cst_18 = arith.constant dense<0.000000e+00> : vector<8x16xf32>
    %20 = tpu.matmul %18, %19, %cst_18 {dimension_numbers = #tpu.dot_dimension_numbers<[1], [1], [0], [0], [0, 0, 1, 0], [], []>} : vector<8x32xbf16>, vector<16x32xbf16>, vector<8x16xf32> -> vector<8x16xf32>
    %cst_19 = arith.constant -8.83883489E+18 : f32
    %21 = vector.shape_cast %16 : vector<1x16xi1> to vector<1x16xi1>
    %22 = vector.broadcast %21 : vector<1x16xi1> to vector<8x16xi1>
    %23 = vector.broadcast %cst_19 : f32 to vector<8x16xf32>
    %24 = arith.select %22, %23, %20 : vector<8x16xi1>, vector<8x16xf32>
    %c0_20 = arith.constant 0 : index
    %c0_21 = arith.constant 0 : index
    %c0_22 = arith.constant 0 : index
    %25 = vector.load %arg17[%c0_20, %c0_21, %c0_22] : memref<4x8x1xf32, #tpu.memory_space<vmem>>, vector<1x8x1xf32>
    %26 = vector.shape_cast %25 : vector<1x8x1xf32> to vector<8x1xf32>
    %cst_23 = arith.constant dense<0xFF800000> : vector<8xf32>
    %27 = vector.multi_reduction <maximumf>, %24, %cst_23 [1] : vector<8x16xf32> to vector<8xf32>
    %28 = vector.shape_cast %27 : vector<8xf32> to vector<8x1xf32>
    %29 = arith.maximumf %26, %28 : vector<8x1xf32>
    %30 = arith.subf %26, %29 : vector<8x1xf32>
    %31 = math.exp %30 : vector<8x1xf32>
    %32 = vector.broadcast %29 : vector<8x1xf32> to vector<8x16xf32>
    %33 = arith.subf %24, %32 : vector<8x16xf32>
    %34 = math.exp %33 : vector<8x16xf32>
    %c0_24 = arith.constant 0 : index
    %c0_25 = arith.constant 0 : index
    %c0_26 = arith.constant 0 : index
    %35 = vector.load %arg18[%c0_24, %c0_25, %c0_26] : memref<4x8x1xf32, #tpu.memory_space<vmem>>, vector<1x8x1xf32>
    %36 = vector.shape_cast %35 : vector<1x8x1xf32> to vector<8x1xf32>
    %37 = arith.mulf %31, %36 : vector<8x1xf32>
    %cst_27 = arith.constant dense<0.000000e+00> : vector<8xf32>
    %38 = vector.multi_reduction <add>, %34, %cst_27 [1] : vector<8x16xf32> to vector<8xf32>
    %39 = vector.shape_cast %38 : vector<8xf32> to vector<8x1xf32>
    %40 = arith.addf %37, %39 : vector<8x1xf32>
    %c0_28 = arith.constant 0 : index
    %c0_29 = arith.constant 0 : index
    %c0_30 = arith.constant 0 : index
    %41 = vector.load %arg18[%c0_28, %c0_29, %c0_30] : memref<4x8x1xf32, #tpu.memory_space<vmem>>, vector<1x8x1xf32>
    %42 = vector.shape_cast %41 : vector<1x8x1xf32> to vector<8x1xf32>
    %43 = vector.shape_cast %40 : vector<8x1xf32> to vector<1x8x1xf32>
    tpu.vector_store %arg18[%c0_28, %c0_29, %c0_30], %43 {strides = array<i32>} : memref<4x8x1xf32, #tpu.memory_space<vmem>>, vector<1x8x1xf32>,
    %c0_31 = arith.constant 0 : index
    %c0_32 = arith.constant 0 : index
    %c0_33 = arith.constant 0 : index
    %44 = vector.load %arg19[%c0_31, %c0_32, %c0_33] : memref<4x8x32xf32, #tpu.memory_space<vmem>>, vector<1x8x32xf32>
    %45 = vector.shape_cast %44 : vector<1x8x32xf32> to vector<8x32xf32>
    %46 = vector.broadcast %31 : vector<8x1xf32> to vector<8x32xf32>
    %47 = arith.mulf %46, %45 : vector<8x32xf32>
    %48 = arith.truncf %34 : vector<8x16xf32> to vector<8x16xbf16>
    %49 = vector.extract_strided_slice %12 {offsets = [0, 0], sizes = [16, 32], strides = [1, 1]} : vector<16x128xbf16> to vector<16x32xbf16>
    %cst_34 = arith.constant dense<0.000000e+00> : vector<8x32xf32>
    %50 = tpu.matmul %48, %49, %cst_34 {dimension_numbers = #tpu.dot_dimension_numbers<[1], [0], [0], [1], [0, 0, 1, 1], [], []>} : vector<8x16xbf16>, vector<16x32xbf16>, vector<8x32xf32> -> vector<8x32xf32>
    %51 = arith.addf %47, %50 : vector<8x32xf32>
    %c0_35 = arith.constant 0 : index
    %c0_36 = arith.constant 0 : index
    %c0_37 = arith.constant 0 : index
    %52 = vector.load %arg19[%c0_35, %c0_36, %c0_37] : memref<4x8x32xf32, #tpu.memory_space<vmem>>, vector<1x8x32xf32>
    %53 = vector.shape_cast %52 : vector<1x8x32xf32> to vector<8x32xf32>
    %54 = vector.shape_cast %51 : vector<8x32xf32> to vector<1x8x32xf32>
    tpu.vector_store %arg19[%c0_35, %c0_36, %c0_37], %54 {strides = array<i32>} : memref<4x8x32xf32, #tpu.memory_space<vmem>>, vector<1x8x32xf32>,
    %c0_38 = arith.constant 0 : index
    %c0_39 = arith.constant 0 : index
    %c0_40 = arith.constant 0 : index
    %55 = vector.load %arg17[%c0_38, %c0_39, %c0_40] : memref<4x8x1xf32, #tpu.memory_space<vmem>>, vector<1x8x1xf32>
    %56 = vector.shape_cast %55 : vector<1x8x1xf32> to vector<8x1xf32>
    %57 = vector.shape_cast %29 : vector<8x1xf32> to vector<1x8x1xf32>
    tpu.vector_store %arg17[%c0_38, %c0_39, %c0_40], %57 {strides = array<i32>} : memref<4x8x1xf32, #tpu.memory_space<vmem>>, vector<1x8x1xf32>,
    %c1 = arith.constant 1 : index
    %c0_41 = arith.constant 0 : index
    %c0_42 = arith.constant 0 : index
    %58 = vector.load %arg16[%c1, %c0_41, %c0_42] : memref<4x8x32xbf16, #tpu.memory_space<vmem>>, vector<1x8x32xbf16>
    %59 = vector.shape_cast %58 : vector<1x8x32xbf16> to vector<8x32xbf16>
    %60 = vector.extract_strided_slice %7 {offsets = [0, 32], sizes = [16, 32], strides = [1, 1]} : vector<16x128xbf16> to vector<16x32xbf16>
    %cst_43 = arith.constant dense<0.000000e+00> : vector<8x16xf32>
    %61 = tpu.matmul %59, %60, %cst_43 {dimension_numbers = #tpu.dot_dimension_numbers<[1], [1], [0], [0], [0, 0, 1, 0], [], []>} : vector<8x32xbf16>, vector<16x32xbf16>, vector<8x16xf32> -> vector<8x16xf32>
    %cst_44 = arith.constant -8.83883489E+18 : f32
    %62 = vector.shape_cast %16 : vector<1x16xi1> to vector<1x16xi1>
    %63 = vector.broadcast %62 : vector<1x16xi1> to vector<8x16xi1>
    %64 = vector.broadcast %cst_44 : f32 to vector<8x16xf32>
    %65 = arith.select %63, %64, %61 : vector<8x16xi1>, vector<8x16xf32>
    %c1_45 = arith.constant 1 : index
    %c0_46 = arith.constant 0 : index
    %c0_47 = arith.constant 0 : index
    %66 = vector.load %arg17[%c1_45, %c0_46, %c0_47] : memref<4x8x1xf32, #tpu.memory_space<vmem>>, vector<1x8x1xf32>
    %67 = vector.shape_cast %66 : vector<1x8x1xf32> to vector<8x1xf32>
    %cst_48 = arith.constant dense<0xFF800000> : vector<8xf32>
    %68 = vector.multi_reduction <maximumf>, %65, %cst_48 [1] : vector<8x16xf32> to vector<8xf32>
    %69 = vector.shape_cast %68 : vector<8xf32> to vector<8x1xf32>
    %70 = arith.maximumf %67, %69 : vector<8x1xf32>
    %71 = arith.subf %67, %70 : vector<8x1xf32>
    %72 = math.exp %71 : vector<8x1xf32>
    %73 = vector.broadcast %70 : vector<8x1xf32> to vector<8x16xf32>
    %74 = arith.subf %65, %73 : vector<8x16xf32>
    %75 = math.exp %74 : vector<8x16xf32>
    %c1_49 = arith.constant 1 : index
    %c0_50 = arith.constant 0 : index
    %c0_51 = arith.constant 0 : index
    %76 = vector.load %arg18[%c1_49, %c0_50, %c0_51] : memref<4x8x1xf32, #tpu.memory_space<vmem>>, vector<1x8x1xf32>
    %77 = vector.shape_cast %76 : vector<1x8x1xf32> to vector<8x1xf32>
    %78 = arith.mulf %72, %77 : vector<8x1xf32>
    %cst_52 = arith.constant dense<0.000000e+00> : vector<8xf32>
    %79 = vector.multi_reduction <add>, %75, %cst_52 [1] : vector<8x16xf32> to vector<8xf32>
    %80 = vector.shape_cast %79 : vector<8xf32> to vector<8x1xf32>
    %81 = arith.addf %78, %80 : vector<8x1xf32>
    %c1_53 = arith.constant 1 : index
    %c0_54 = arith.constant 0 : index
    %c0_55 = arith.constant 0 : index
    %82 = vector.load %arg18[%c1_53, %c0_54, %c0_55] : memref<4x8x1xf32, #tpu.memory_space<vmem>>, vector<1x8x1xf32>
    %83 = vector.shape_cast %82 : vector<1x8x1xf32> to vector<8x1xf32>
    %84 = vector.shape_cast %81 : vector<8x1xf32> to vector<1x8x1xf32>
    tpu.vector_store %arg18[%c1_53, %c0_54, %c0_55], %84 {strides = array<i32>} : memref<4x8x1xf32, #tpu.memory_space<vmem>>, vector<1x8x1xf32>,
    %c1_56 = arith.constant 1 : index
    %c0_57 = arith.constant 0 : index
    %c0_58 = arith.constant 0 : index
    %85 = vector.load %arg19[%c1_56, %c0_57, %c0_58] : memref<4x8x32xf32, #tpu.memory_space<vmem>>, vector<1x8x32xf32>
    %86 = vector.shape_cast %85 : vector<1x8x32xf32> to vector<8x32xf32>
    %87 = vector.broadcast %72 : vector<8x1xf32> to vector<8x32xf32>
    %88 = arith.mulf %87, %86 : vector<8x32xf32>
    %89 = arith.truncf %75 : vector<8x16xf32> to vector<8x16xbf16>
    %90 = vector.extract_strided_slice %12 {offsets = [0, 32], sizes = [16, 32], strides = [1, 1]} : vector<16x128xbf16> to vector<16x32xbf16>
    %cst_59 = arith.constant dense<0.000000e+00> : vector<8x32xf32>
    %91 = tpu.matmul %89, %90, %cst_59 {dimension_numbers = #tpu.dot_dimension_numbers<[1], [0], [0], [1], [0, 0, 1, 1], [], []>} : vector<8x16xbf16>, vector<16x32xbf16>, vector<8x32xf32> -> vector<8x32xf32>
    %92 = arith.addf %88, %91 : vector<8x32xf32>
    %c1_60 = arith.constant 1 : index
    %c0_61 = arith.constant 0 : index
    %c0_62 = arith.constant 0 : index
    %93 = vector.load %arg19[%c1_60, %c0_61, %c0_62] : memref<4x8x32xf32, #tpu.memory_space<vmem>>, vector<1x8x32xf32>
    %94 = vector.shape_cast %93 : vector<1x8x32xf32> to vector<8x32xf32>
    %95 = vector.shape_cast %92 : vector<8x32xf32> to vector<1x8x32xf32>
    tpu.vector_store %arg19[%c1_60, %c0_61, %c0_62], %95 {strides = array<i32>} : memref<4x8x32xf32, #tpu.memory_space<vmem>>, vector<1x8x32xf32>,
    %c1_63 = arith.constant 1 : index
    %c0_64 = arith.constant 0 : index
    %c0_65 = arith.constant 0 : index
    %96 = vector.load %arg17[%c1_63, %c0_64, %c0_65] : memref<4x8x1xf32, #tpu.memory_space<vmem>>, vector<1x8x1xf32>
    %97 = vector.shape_cast %96 : vector<1x8x1xf32> to vector<8x1xf32>
    %98 = vector.shape_cast %70 : vector<8x1xf32> to vector<1x8x1xf32>
    tpu.vector_store %arg17[%c1_63, %c0_64, %c0_65], %98 {strides = array<i32>} : memref<4x8x1xf32, #tpu.memory_space<vmem>>, vector<1x8x1xf32>,
    %c2 = arith.constant 2 : index
    %c0_66 = arith.constant 0 : index
    %c0_67 = arith.constant 0 : index
    %99 = vector.load %arg16[%c2, %c0_66, %c0_67] : memref<4x8x32xbf16, #tpu.memory_space<vmem>>, vector<1x8x32xbf16>
    %100 = vector.shape_cast %99 : vector<1x8x32xbf16> to vector<8x32xbf16>
    %101 = vector.extract_strided_slice %7 {offsets = [0, 64], sizes = [16, 32], strides = [1, 1]} : vector<16x128xbf16> to vector<16x32xbf16>
    %cst_68 = arith.constant dense<0.000000e+00> : vector<8x16xf32>
    %102 = tpu.matmul %100, %101, %cst_68 {dimension_numbers = #tpu.dot_dimension_numbers<[1], [1], [0], [0], [0, 0, 1, 0], [], []>} : vector<8x32xbf16>, vector<16x32xbf16>, vector<8x16xf32> -> vector<8x16xf32>
    %cst_69 = arith.constant -8.83883489E+18 : f32
    %103 = vector.shape_cast %16 : vector<1x16xi1> to vector<1x16xi1>
    %104 = vector.broadcast %103 : vector<1x16xi1> to vector<8x16xi1>
    %105 = vector.broadcast %cst_69 : f32 to vector<8x16xf32>
    %106 = arith.select %104, %105, %102 : vector<8x16xi1>, vector<8x16xf32>
    %c2_70 = arith.constant 2 : index
    %c0_71 = arith.constant 0 : index
    %c0_72 = arith.constant 0 : index
    %107 = vector.load %arg17[%c2_70, %c0_71, %c0_72] : memref<4x8x1xf32, #tpu.memory_space<vmem>>, vector<1x8x1xf32>
    %108 = vector.shape_cast %107 : vector<1x8x1xf32> to vector<8x1xf32>
    %cst_73 = arith.constant dense<0xFF800000> : vector<8xf32>
    %109 = vector.multi_reduction <maximumf>, %106, %cst_73 [1] : vector<8x16xf32> to vector<8xf32>
    %110 = vector.shape_cast %109 : vector<8xf32> to vector<8x1xf32>
    %111 = arith.maximumf %108, %110 : vector<8x1xf32>
    %112 = arith.subf %108, %111 : vector<8x1xf32>
    %113 = math.exp %112 : vector<8x1xf32>
    %114 = vector.broadcast %111 : vector<8x1xf32> to vector<8x16xf32>
    %115 = arith.subf %106, %114 : vector<8x16xf32>
    %116 = math.exp %115 : vector<8x16xf32>
    %c2_74 = arith.constant 2 : index
    %c0_75 = arith.constant 0 : index
    %c0_76 = arith.constant 0 : index
    %117 = vector.load %arg18[%c2_74, %c0_75, %c0_76] : memref<4x8x1xf32, #tpu.memory_space<vmem>>, vector<1x8x1xf32>
    %118 = vector.shape_cast %117 : vector<1x8x1xf32> to vector<8x1xf32>
    %119 = arith.mulf %113, %118 : vector<8x1xf32>
    %cst_77 = arith.constant dense<0.000000e+00> : vector<8xf32>
    %120 = vector.multi_reduction <add>, %116, %cst_77 [1] : vector<8x16xf32> to vector<8xf32>
    %121 = vector.shape_cast %120 : vector<8xf32> to vector<8x1xf32>
    %122 = arith.addf %119, %121 : vector<8x1xf32>
    %c2_78 = arith.constant 2 : index
    %c0_79 = arith.constant 0 : index
    %c0_80 = arith.constant 0 : index
    %123 = vector.load %arg18[%c2_78, %c0_79, %c0_80] : memref<4x8x1xf32, #tpu.memory_space<vmem>>, vector<1x8x1xf32>
    %124 = vector.shape_cast %123 : vector<1x8x1xf32> to vector<8x1xf32>
    %125 = vector.shape_cast %122 : vector<8x1xf32> to vector<1x8x1xf32>
    tpu.vector_store %arg18[%c2_78, %c0_79, %c0_80], %125 {strides = array<i32>} : memref<4x8x1xf32, #tpu.memory_space<vmem>>, vector<1x8x1xf32>,
    %c2_81 = arith.constant 2 : index
    %c0_82 = arith.constant 0 : index
    %c0_83 = arith.constant 0 : index
    %126 = vector.load %arg19[%c2_81, %c0_82, %c0_83] : memref<4x8x32xf32, #tpu.memory_space<vmem>>, vector<1x8x32xf32>
    %127 = vector.shape_cast %126 : vector<1x8x32xf32> to vector<8x32xf32>
    %128 = vector.broadcast %113 : vector<8x1xf32> to vector<8x32xf32>
    %129 = arith.mulf %128, %127 : vector<8x32xf32>
    %130 = arith.truncf %116 : vector<8x16xf32> to vector<8x16xbf16>
    %131 = vector.extract_strided_slice %12 {offsets = [0, 64], sizes = [16, 32], strides = [1, 1]} : vector<16x128xbf16> to vector<16x32xbf16>
    %cst_84 = arith.constant dense<0.000000e+00> : vector<8x32xf32>
    %132 = tpu.matmul %130, %131, %cst_84 {dimension_numbers = #tpu.dot_dimension_numbers<[1], [0], [0], [1], [0, 0, 1, 1], [], []>} : vector<8x16xbf16>, vector<16x32xbf16>, vector<8x32xf32> -> vector<8x32xf32>
    %133 = arith.addf %129, %132 : vector<8x32xf32>
    %c2_85 = arith.constant 2 : index
    %c0_86 = arith.constant 0 : index
    %c0_87 = arith.constant 0 : index
    %134 = vector.load %arg19[%c2_85, %c0_86, %c0_87] : memref<4x8x32xf32, #tpu.memory_space<vmem>>, vector<1x8x32xf32>
    %135 = vector.shape_cast %134 : vector<1x8x32xf32> to vector<8x32xf32>
    %136 = vector.shape_cast %133 : vector<8x32xf32> to vector<1x8x32xf32>
    tpu.vector_store %arg19[%c2_85, %c0_86, %c0_87], %136 {strides = array<i32>} : memref<4x8x32xf32, #tpu.memory_space<vmem>>, vector<1x8x32xf32>,
    %c2_88 = arith.constant 2 : index
    %c0_89 = arith.constant 0 : index
    %c0_90 = arith.constant 0 : index
    %137 = vector.load %arg17[%c2_88, %c0_89, %c0_90] : memref<4x8x1xf32, #tpu.memory_space<vmem>>, vector<1x8x1xf32>
    %138 = vector.shape_cast %137 : vector<1x8x1xf32> to vector<8x1xf32>
    %139 = vector.shape_cast %111 : vector<8x1xf32> to vector<1x8x1xf32>
    tpu.vector_store %arg17[%c2_88, %c0_89, %c0_90], %139 {strides = array<i32>} : memref<4x8x1xf32, #tpu.memory_space<vmem>>, vector<1x8x1xf32>,
    %c3 = arith.constant 3 : index
    %c0_91 = arith.constant 0 : index
    %c0_92 = arith.constant 0 : index
    %140 = vector.load %arg16[%c3, %c0_91, %c0_92] : memref<4x8x32xbf16, #tpu.memory_space<vmem>>, vector<1x8x32xbf16>
    %141 = vector.shape_cast %140 : vector<1x8x32xbf16> to vector<8x32xbf16>
    %142 = vector.extract_strided_slice %7 {offsets = [0, 96], sizes = [16, 32], strides = [1, 1]} : vector<16x128xbf16> to vector<16x32xbf16>
    %cst_93 = arith.constant dense<0.000000e+00> : vector<8x16xf32>
    %143 = tpu.matmul %141, %142, %cst_93 {dimension_numbers = #tpu.dot_dimension_numbers<[1], [1], [0], [0], [0, 0, 1, 0], [], []>} : vector<8x32xbf16>, vector<16x32xbf16>, vector<8x16xf32> -> vector<8x16xf32>
    %cst_94 = arith.constant -8.83883489E+18 : f32
    %144 = vector.shape_cast %16 : vector<1x16xi1> to vector<1x16xi1>
    %145 = vector.broadcast %144 : vector<1x16xi1> to vector<8x16xi1>
    %146 = vector.broadcast %cst_94 : f32 to vector<8x16xf32>
    %147 = arith.select %145, %146, %143 : vector<8x16xi1>, vector<8x16xf32>
    %c3_95 = arith.constant 3 : index
    %c0_96 = arith.constant 0 : index
    %c0_97 = arith.constant 0 : index
    %148 = vector.load %arg17[%c3_95, %c0_96, %c0_97] : memref<4x8x1xf32, #tpu.memory_space<vmem>>, vector<1x8x1xf32>
    %149 = vector.shape_cast %148 : vector<1x8x1xf32> to vector<8x1xf32>
    %cst_98 = arith.constant dense<0xFF800000> : vector<8xf32>
    %150 = vector.multi_reduction <maximumf>, %147, %cst_98 [1] : vector<8x16xf32> to vector<8xf32>
    %151 = vector.shape_cast %150 : vector<8xf32> to vector<8x1xf32>
    %152 = arith.maximumf %149, %151 : vector<8x1xf32>
    %153 = arith.subf %149, %152 : vector<8x1xf32>
    %154 = math.exp %153 : vector<8x1xf32>
    %155 = vector.broadcast %152 : vector<8x1xf32> to vector<8x16xf32>
    %156 = arith.subf %147, %155 : vector<8x16xf32>
    %157 = math.exp %156 : vector<8x16xf32>
    %c3_99 = arith.constant 3 : index
    %c0_100 = arith.constant 0 : index
    %c0_101 = arith.constant 0 : index
    %158 = vector.load %arg18[%c3_99, %c0_100, %c0_101] : memref<4x8x1xf32, #tpu.memory_space<vmem>>, vector<1x8x1xf32>
    %159 = vector.shape_cast %158 : vector<1x8x1xf32> to vector<8x1xf32>
    %160 = arith.mulf %154, %159 : vector<8x1xf32>
    %cst_102 = arith.constant dense<0.000000e+00> : vector<8xf32>
    %161 = vector.multi_reduction <add>, %157, %cst_102 [1] : vector<8x16xf32> to vector<8xf32>
    %162 = vector.shape_cast %161 : vector<8xf32> to vector<8x1xf32>
    %163 = arith.addf %160, %162 : vector<8x1xf32>
    %c3_103 = arith.constant 3 : index
    %c0_104 = arith.constant 0 : index
    %c0_105 = arith.constant 0 : index
    %164 = vector.load %arg18[%c3_103, %c0_104, %c0_105] : memref<4x8x1xf32, #tpu.memory_space<vmem>>, vector<1x8x1xf32>
    %165 = vector.shape_cast %164 : vector<1x8x1xf32> to vector<8x1xf32>
    %166 = vector.shape_cast %163 : vector<8x1xf32> to vector<1x8x1xf32>
    tpu.vector_store %arg18[%c3_103, %c0_104, %c0_105], %166 {strides = array<i32>} : memref<4x8x1xf32, #tpu.memory_space<vmem>>, vector<1x8x1xf32>,
    %c3_106 = arith.constant 3 : index
    %c0_107 = arith.constant 0 : index
    %c0_108 = arith.constant 0 : index
    %167 = vector.load %arg19[%c3_106, %c0_107, %c0_108] : memref<4x8x32xf32, #tpu.memory_space<vmem>>, vector<1x8x32xf32>
    %168 = vector.shape_cast %167 : vector<1x8x32xf32> to vector<8x32xf32>
    %169 = vector.broadcast %154 : vector<8x1xf32> to vector<8x32xf32>
    %170 = arith.mulf %169, %168 : vector<8x32xf32>
    %171 = arith.truncf %157 : vector<8x16xf32> to vector<8x16xbf16>
    %172 = vector.extract_strided_slice %12 {offsets = [0, 96], sizes = [16, 32], strides = [1, 1]} : vector<16x128xbf16> to vector<16x32xbf16>
    %cst_109 = arith.constant dense<0.000000e+00> : vector<8x32xf32>
    %173 = tpu.matmul %171, %172, %cst_109 {dimension_numbers = #tpu.dot_dimension_numbers<[1], [0], [0], [1], [0, 0, 1, 1], [], []>} : vector<8x16xbf16>, vector<16x32xbf16>, vector<8x32xf32> -> vector<8x32xf32>
    %174 = arith.addf %170, %173 : vector<8x32xf32>
    %c3_110 = arith.constant 3 : index
    %c0_111 = arith.constant 0 : index
    %c0_112 = arith.constant 0 : index
    %175 = vector.load %arg19[%c3_110, %c0_111, %c0_112] : memref<4x8x32xf32, #tpu.memory_space<vmem>>, vector<1x8x32xf32>
    %176 = vector.shape_cast %175 : vector<1x8x32xf32> to vector<8x32xf32>
    %177 = vector.shape_cast %174 : vector<8x32xf32> to vector<1x8x32xf32>
    tpu.vector_store %arg19[%c3_110, %c0_111, %c0_112], %177 {strides = array<i32>} : memref<4x8x32xf32, #tpu.memory_space<vmem>>, vector<1x8x32xf32>,
    %c3_113 = arith.constant 3 : index
    %c0_114 = arith.constant 0 : index
    %c0_115 = arith.constant 0 : index
    %178 = vector.load %arg17[%c3_113, %c0_114, %c0_115] : memref<4x8x1xf32, #tpu.memory_space<vmem>>, vector<1x8x1xf32>
    %179 = vector.shape_cast %178 : vector<1x8x1xf32> to vector<8x1xf32>
    %180 = vector.shape_cast %152 : vector<8x1xf32> to vector<1x8x1xf32>
    tpu.vector_store %arg17[%c3_113, %c0_114, %c0_115], %180 {strides = array<i32>} : memref<4x8x1xf32, #tpu.memory_space<vmem>>, vector<1x8x1xf32>,
    %c0_i32_116 = arith.constant 0 : i32
    %181 = arith.cmpi eq, %arg2, %c0_i32_116 : i32
    %182 = arith.extui %181 : i1 to i32
    %c0_i32_117 = arith.constant 0 : i32
    %183 = arith.cmpi ne, %182, %c0_i32_117 : i32
    scf.if %183 {
      %c0_118 = arith.constant 0 : index
      %c0_119 = arith.constant 0 : index
      %c0_120 = arith.constant 0 : index
      %184 = vector.load %arg19[%c0_118, %c0_119, %c0_120] : memref<4x8x32xf32, #tpu.memory_space<vmem>>, vector<1x8x32xf32>
      %185 = vector.shape_cast %184 : vector<1x8x32xf32> to vector<8x32xf32>
      %c0_121 = arith.constant 0 : index
      %c0_122 = arith.constant 0 : index
      %c0_123 = arith.constant 0 : index
      %186 = vector.load %arg18[%c0_121, %c0_122, %c0_123] : memref<4x8x1xf32, #tpu.memory_space<vmem>>, vector<1x8x1xf32>
      %187 = vector.shape_cast %186 : vector<1x8x1xf32> to vector<8x1xf32>
      %188 = tpu.reciprocal %187 {approx = true} : vector<8x1xf32> -> vector<8x1xf32>
      %189 = vector.broadcast %188 : vector<8x1xf32> to vector<8x32xf32>
      %190 = arith.mulf %185, %189 : vector<8x32xf32>
      %c1_124 = arith.constant 1 : index
      %c0_125 = arith.constant 0 : index
      %c0_126 = arith.constant 0 : index
      %191 = vector.load %arg19[%c1_124, %c0_125, %c0_126] : memref<4x8x32xf32, #tpu.memory_space<vmem>>, vector<1x8x32xf32>
      %192 = vector.shape_cast %191 : vector<1x8x32xf32> to vector<8x32xf32>
      %c1_127 = arith.constant 1 : index
      %c0_128 = arith.constant 0 : index
      %c0_129 = arith.constant 0 : index
      %193 = vector.load %arg18[%c1_127, %c0_128, %c0_129] : memref<4x8x1xf32, #tpu.memory_space<vmem>>, vector<1x8x1xf32>
      %194 = vector.shape_cast %193 : vector<1x8x1xf32> to vector<8x1xf32>
      %195 = tpu.reciprocal %194 {approx = true} : vector<8x1xf32> -> vector<8x1xf32>
      %196 = vector.broadcast %195 : vector<8x1xf32> to vector<8x32xf32>
      %197 = arith.mulf %192, %196 : vector<8x32xf32>
      %c2_130 = arith.constant 2 : index
      %c0_131 = arith.constant 0 : index
      %c0_132 = arith.constant 0 : index
      %198 = vector.load %arg19[%c2_130, %c0_131, %c0_132] : memref<4x8x32xf32, #tpu.memory_space<vmem>>, vector<1x8x32xf32>
      %199 = vector.shape_cast %198 : vector<1x8x32xf32> to vector<8x32xf32>
      %c2_133 = arith.constant 2 : index
      %c0_134 = arith.constant 0 : index
      %c0_135 = arith.constant 0 : index
      %200 = vector.load %arg18[%c2_133, %c0_134, %c0_135] : memref<4x8x1xf32, #tpu.memory_space<vmem>>, vector<1x8x1xf32>
      %201 = vector.shape_cast %200 : vector<1x8x1xf32> to vector<8x1xf32>
      %202 = tpu.reciprocal %201 {approx = true} : vector<8x1xf32> -> vector<8x1xf32>
      %203 = vector.broadcast %202 : vector<8x1xf32> to vector<8x32xf32>
      %204 = arith.mulf %199, %203 : vector<8x32xf32>
      %c3_136 = arith.constant 3 : index
      %c0_137 = arith.constant 0 : index
      %c0_138 = arith.constant 0 : index
      %205 = vector.load %arg19[%c3_136, %c0_137, %c0_138] : memref<4x8x32xf32, #tpu.memory_space<vmem>>, vector<1x8x32xf32>
      %206 = vector.shape_cast %205 : vector<1x8x32xf32> to vector<8x32xf32>
      %c3_139 = arith.constant 3 : index
      %c0_140 = arith.constant 0 : index
      %c0_141 = arith.constant 0 : index
      %207 = vector.load %arg18[%c3_139, %c0_140, %c0_141] : memref<4x8x1xf32, #tpu.memory_space<vmem>>, vector<1x8x1xf32>
      %208 = vector.shape_cast %207 : vector<1x8x1xf32> to vector<8x1xf32>
      %209 = tpu.reciprocal %208 {approx = true} : vector<8x1xf32> -> vector<8x1xf32>
      %210 = vector.broadcast %209 : vector<8x1xf32> to vector<8x32xf32>
      %211 = arith.mulf %206, %210 : vector<8x32xf32>
      %212 = tpu.concatenate %190, %197, %204, %211 in 1 : vector<8x32xf32>, vector<8x32xf32>, vector<8x32xf32>, vector<8x32xf32> -> vector<8x128xf32>
      %c0_142 = arith.constant 0 : index
      %c0_143 = arith.constant 0 : index
      %213 = vector.load %arg11[%c0_142, %c0_143] : memref<8x128xf32, #tpu.memory_space<vmem>>, vector<1x128xf32>
      %c1_144 = arith.constant 1 : index
      %c0_145 = arith.constant 0 : index
      %214 = vector.load %arg11[%c1_144, %c0_145] : memref<8x128xf32, #tpu.memory_space<vmem>>, vector<1x128xf32>
      %c2_146 = arith.constant 2 : index
      %c0_147 = arith.constant 0 : index
      %215 = vector.load %arg11[%c2_146, %c0_147] : memref<8x128xf32, #tpu.memory_space<vmem>>, vector<1x128xf32>
      %c3_148 = arith.constant 3 : index
      %c0_149 = arith.constant 0 : index
      %216 = vector.load %arg11[%c3_148, %c0_149] : memref<8x128xf32, #tpu.memory_space<vmem>>, vector<1x128xf32>
      %c4 = arith.constant 4 : index
      %c0_150 = arith.constant 0 : index
      %217 = vector.load %arg11[%c4, %c0_150] : memref<8x128xf32, #tpu.memory_space<vmem>>, vector<1x128xf32>
      %c5 = arith.constant 5 : index
      %c0_151 = arith.constant 0 : index
      %218 = vector.load %arg11[%c5, %c0_151] : memref<8x128xf32, #tpu.memory_space<vmem>>, vector<1x128xf32>
      %219 = arith.truncf %212 : vector<8x128xf32> to vector<8x128xbf16>
      %c0_152 = arith.constant 0 : index
      %c0_153 = arith.constant 0 : index
      %220 = vector.load %arg10[%c0_152, %c0_153] : memref<128x128xbf16, #tpu.memory_space<vmem>>, vector<128x128xbf16>
      %cst_154 = arith.constant dense<0.000000e+00> : vector<8x128xf32>
      %221 = tpu.matmul %219, %220, %cst_154 {dimension_numbers = #tpu.dot_dimension_numbers<[1], [0], [0], [1], [0, 0, 1, 1], [], []>} : vector<8x128xbf16>, vector<128x128xbf16>, vector<8x128xf32> -> vector<8x128xf32>
      %222 = vector.broadcast %213 : vector<1x128xf32> to vector<8x128xf32>
      %223 = arith.addf %221, %222 : vector<8x128xf32>
      %c0_155 = arith.constant 0 : index
      %c0_156 = arith.constant 0 : index
      %c0_157 = arith.constant 0 : index
      %224 = vector.load %arg3[%c0_155, %c0_156, %c0_157] : memref<1x8x128xf32, #tpu.memory_space<vmem>>, vector<1x8x128xf32>
      %225 = vector.shape_cast %224 : vector<1x8x128xf32> to vector<8x128xf32>
      %cst_158 = arith.constant dense<0.000000e+00> : vector<8xf32>
      %226 = vector.multi_reduction <add>, %223, %cst_158 [1] : vector<8x128xf32> to vector<8xf32>
      %227 = vector.shape_cast %226 : vector<8xf32> to vector<8x1xf32>
      %cst_159 = arith.constant 1.280000e+02 : f32
      %228 = vector.broadcast %cst_159 : f32 to vector<8x1xf32>
      %229 = arith.divf %227, %228 : vector<8x1xf32>
      %230 = vector.broadcast %229 : vector<8x1xf32> to vector<8x128xf32>
      %231 = arith.subf %223, %230 : vector<8x128xf32>
      %232 = arith.mulf %231, %231 : vector<8x128xf32>
      %cst_160 = arith.constant dense<0.000000e+00> : vector<8xf32>
      %233 = vector.multi_reduction <add>, %232, %cst_160 [1] : vector<8x128xf32> to vector<8xf32>
      %234 = vector.shape_cast %233 : vector<8xf32> to vector<8x1xf32>
      %cst_161 = arith.constant 1.280000e+02 : f32
      %235 = vector.broadcast %cst_161 : f32 to vector<8x1xf32>
      %236 = arith.divf %234, %235 : vector<8x1xf32>
      %237 = vector.broadcast %229 : vector<8x1xf32> to vector<8x128xf32>
      %238 = arith.subf %223, %237 : vector<8x128xf32>
      %cst_162 = arith.constant 9.99999974E-6 : f32
      %239 = vector.broadcast %cst_162 : f32 to vector<8x1xf32>
      %240 = arith.addf %236, %239 : vector<8x1xf32>
      %241 = math.rsqrt %240 : vector<8x1xf32>
      %242 = vector.broadcast %241 : vector<8x1xf32> to vector<8x128xf32>
      %243 = arith.mulf %238, %242 : vector<8x128xf32>
      %244 = vector.broadcast %214 : vector<1x128xf32> to vector<8x128xf32>
      %245 = arith.mulf %243, %244 : vector<8x128xf32>
      %246 = vector.broadcast %215 : vector<1x128xf32> to vector<8x128xf32>
      %247 = arith.addf %245, %246 : vector<8x128xf32>
      %248 = arith.addf %225, %247 : vector<8x128xf32>
      %249 = arith.truncf %248 : vector<8x128xf32> to vector<8x128xbf16>
      %c0_163 = arith.constant 0 : index
      %c0_164 = arith.constant 0 : index
      %250 = vector.load %arg12[%c0_163, %c0_164] : memref<128x256xbf16, #tpu.memory_space<vmem>>, vector<128x256xbf16>
      %cst_165 = arith.constant dense<0.000000e+00> : vector<8x256xf32>
      %251 = tpu.matmul %249, %250, %cst_165 {dimension_numbers = #tpu.dot_dimension_numbers<[1], [0], [0], [1], [0, 0, 1, 1], [], []>} : vector<8x128xbf16>, vector<128x256xbf16>, vector<8x256xf32> -> vector<8x256xf32>
      %c0_166 = arith.constant 0 : index
      %c0_167 = arith.constant 0 : index
      %252 = vector.load %arg13[%c0_166, %c0_167] : memref<1x256xf32, #tpu.memory_space<vmem>>, vector<1x256xf32>
      %253 = vector.broadcast %252 : vector<1x256xf32> to vector<8x256xf32>
      %254 = arith.addf %251, %253 : vector<8x256xf32>
      %cst_168 = arith.constant 0.000000e+00 : f32
      %255 = vector.broadcast %cst_168 : f32 to vector<8x256xf32>
      %256 = arith.maximumf %254, %255 : vector<8x256xf32>
      %257 = arith.truncf %256 : vector<8x256xf32> to vector<8x256xbf16>
      %c0_169 = arith.constant 0 : index
      %c0_170 = arith.constant 0 : index
      %258 = vector.load %arg14[%c0_169, %c0_170] : memref<256x128xbf16, #tpu.memory_space<vmem>>, vector<256x128xbf16>
      %cst_171 = arith.constant dense<0.000000e+00> : vector<8x128xf32>
      %259 = tpu.matmul %257, %258, %cst_171 {dimension_numbers = #tpu.dot_dimension_numbers<[1], [0], [0], [1], [0, 0, 1, 1], [], []>} : vector<8x256xbf16>, vector<256x128xbf16>, vector<8x128xf32> -> vector<8x128xf32>
      %260 = vector.broadcast %216 : vector<1x128xf32> to vector<8x128xf32>
      %261 = arith.addf %259, %260 : vector<8x128xf32>
      %cst_172 = arith.constant dense<0.000000e+00> : vector<8xf32>
      %262 = vector.multi_reduction <add>, %261, %cst_172 [1] : vector<8x128xf32> to vector<8xf32>
      %263 = vector.shape_cast %262 : vector<8xf32> to vector<8x1xf32>
      %cst_173 = arith.constant 1.280000e+02 : f32
      %264 = vector.broadcast %cst_173 : f32 to vector<8x1xf32>
      %265 = arith.divf %263, %264 : vector<8x1xf32>
      %266 = vector.broadcast %265 : vector<8x1xf32> to vector<8x128xf32>
      %267 = arith.subf %261, %266 : vector<8x128xf32>
      %268 = arith.mulf %267, %267 : vector<8x128xf32>
      %cst_174 = arith.constant dense<0.000000e+00> : vector<8xf32>
      %269 = vector.multi_reduction <add>, %268, %cst_174 [1] : vector<8x128xf32> to vector<8xf32>
      %270 = vector.shape_cast %269 : vector<8xf32> to vector<8x1xf32>
      %cst_175 = arith.constant 1.280000e+02 : f32
      %271 = vector.broadcast %cst_175 : f32 to vector<8x1xf32>
      %272 = arith.divf %270, %271 : vector<8x1xf32>
      %273 = vector.broadcast %265 : vector<8x1xf32> to vector<8x128xf32>
      %274 = arith.subf %261, %273 : vector<8x128xf32>
      %cst_176 = arith.constant 9.99999974E-6 : f32
      %275 = vector.broadcast %cst_176 : f32 to vector<8x1xf32>
      %276 = arith.addf %272, %275 : vector<8x1xf32>
      %277 = math.rsqrt %276 : vector<8x1xf32>
      %278 = vector.broadcast %277 : vector<8x1xf32> to vector<8x128xf32>
      %279 = arith.mulf %274, %278 : vector<8x128xf32>
      %280 = vector.broadcast %217 : vector<1x128xf32> to vector<8x128xf32>
      %281 = arith.mulf %279, %280 : vector<8x128xf32>
      %282 = vector.broadcast %218 : vector<1x128xf32> to vector<8x128xf32>
      %283 = arith.addf %281, %282 : vector<8x128xf32>
      %284 = arith.addf %248, %283 : vector<8x128xf32>
      %c0_177 = arith.constant 0 : index
      %c0_178 = arith.constant 0 : index
      %c0_179 = arith.constant 0 : index
      %285 = vector.load %arg15[%c0_177, %c0_178, %c0_179] : memref<1x8x128xf32, #tpu.memory_space<vmem>>, vector<1x8x128xf32>
      %286 = vector.shape_cast %285 : vector<1x8x128xf32> to vector<8x128xf32>
      %287 = vector.shape_cast %284 : vector<8x128xf32> to vector<1x8x128xf32>
      tpu.vector_store %arg15[%c0_177, %c0_178, %c0_179], %287 {strides = array<i32>} : memref<1x8x128xf32, #tpu.memory_space<vmem>>, vector<1x8x128xf32>,
    } else {
    }
    return
  }
  func.func @transform_0(%arg0: i32, %arg1: i32, %arg2: i32) -> (i32, i32, i32) {
    %c0_i32 = arith.constant 0 : i32
    %c0_i32_0 = arith.constant 0 : i32
    return %arg0, %arg1, %c0_i32 : i32, i32, i32
  }
  func.func @transform_1(%arg0: i32, %arg1: i32, %arg2: i32) -> (i32, i32, i32) {
    %c0_i32 = arith.constant 0 : i32
    %c0_i32_0 = arith.constant 0 : i32
    return %arg0, %arg2, %c0_i32 : i32, i32, i32
  }
  func.func @transform_2(%arg0: i32, %arg1: i32, %arg2: i32) -> (i32, i32, i32) {
    %c0_i32 = arith.constant 0 : i32
    %c0_i32_0 = arith.constant 0 : i32
    return %arg0, %arg2, %c0_i32 : i32, i32, i32
  }
  func.func @transform_3(%arg0: i32, %arg1: i32, %arg2: i32) -> (i32, i32, i32) {
    %c0_i32 = arith.constant 0 : i32
    %c0_i32_0 = arith.constant 0 : i32
    return %arg0, %c0_i32, %arg2 : i32, i32, i32
  }
  func.func @transform_4(%arg0: i32, %arg1: i32, %arg2: i32) -> (i32, i32) {
    %c0_i32 = arith.constant 0 : i32
    %c0_i32_0 = arith.constant 0 : i32
    %c0_i32_1 = arith.constant 0 : i32
    return %c0_i32, %c0_i32_0 : i32, i32
  }
  func.func @transform_5(%arg0: i32, %arg1: i32, %arg2: i32) -> (i32, i32) {
    %c0_i32 = arith.constant 0 : i32
    %c0_i32_0 = arith.constant 0 : i32
    %c0_i32_1 = arith.constant 0 : i32
    return %c0_i32, %c0_i32_0 : i32, i32
  }
  func.func @transform_6(%arg0: i32, %arg1: i32, %arg2: i32) -> (i32, i32) {
    %c0_i32 = arith.constant 0 : i32
    %c0_i32_0 = arith.constant 0 : i32
    %c0_i32_1 = arith.constant 0 : i32
    return %c0_i32, %c0_i32_0 : i32, i32
  }
  func.func @transform_7(%arg0: i32, %arg1: i32, %arg2: i32) -> (i32, i32) {
    %c0_i32 = arith.constant 0 : i32
    %c0_i32_0 = arith.constant 0 : i32
    %c0_i32_1 = arith.constant 0 : i32
    return %c0_i32, %c0_i32_0 : i32, i32
  }
  func.func @transform_8(%arg0: i32, %arg1: i32, %arg2: i32) -> (i32, i32) {
    %c0_i32 = arith.constant 0 : i32
    %c0_i32_0 = arith.constant 0 : i32
    %c0_i32_1 = arith.constant 0 : i32
    return %c0_i32, %c0_i32_0 : i32, i32
  }
  func.func @transform_9(%arg0: i32, %arg1: i32, %arg2: i32) -> (i32, i32) {
    %c0_i32 = arith.constant 0 : i32
    %c0_i32_0 = arith.constant 0 : i32
    %c0_i32_1 = arith.constant 0 : i32
    return %c0_i32, %c0_i32_0 : i32, i32
  }
  func.func @transform_10(%arg0: i32, %arg1: i32, %arg2: i32) -> (i32, i32) {
    %c0_i32 = arith.constant 0 : i32
    %c0_i32_0 = arith.constant 0 : i32
    %c0_i32_1 = arith.constant 0 : i32
    return %c0_i32, %c0_i32_0 : i32, i32
  }
  func.func @transform_11(%arg0: i32, %arg1: i32, %arg2: i32) -> (i32, i32) {
    %c0_i32 = arith.constant 0 : i32
    %c0_i32_0 = arith.constant 0 : i32
    %c0_i32_1 = arith.constant 0 : i32
    return %c0_i32, %c0_i32_0 : i32, i32
  }
  func.func @transform_12(%arg0: i32, %arg1: i32, %arg2: i32) -> (i32, i32, i32) {
    %c0_i32 = arith.constant 0 : i32
    %c0_i32_0 = arith.constant 0 : i32
    return %arg0, %arg1, %c0_i32 : i32, i32, i32
  }
}

</mosaic_0001>

<bundles_post_ra>
// kernel: tpu_custom_call.1
= control target key start
LH: loop header
LB: loop body
LE: loop exit
PB: predicated region body
PF: predicated region fallthrough
CT: control target
= control target key end

     0   :  { %s4044_s0 = inlined_call_operand.hbm [shape: f32[2,8,128], index: 0, kind: input, shape index: {}]   ;;  %s4045_s1 = inlined_call_operand.hbm [shape: bf16[2,16,128], index: 1, kind: input, shape index: {}]   ;;  %s4046_s2 = inlined_call_operand.hbm [shape: bf16[2,16,128], index: 2, kind: input, shape index: {}]   ;;  %s4047_s3 = inlined_call_operand.vmem [shape: s32[2,1,16], index: 3, kind: input, shape index: {}]   ;;  %s4048_s4 = inlined_call_operand.hbm [shape: bf16[128,128], index: 4, kind: input, shape index: {}]   ;;  %s4049_s5 = inlined_call_operand.hbm [shape: bf16[128,128], index: 5, kind: input, shape index: {}]   ;;  %s4050_s6 = inlined_call_operand.hbm [shape: bf16[128,128], index: 6, kind: input, shape index: {}]   ;;  %s4051_s7 = inlined_call_operand.hbm [shape: bf16[128,128], index: 7, kind: input, shape index: {}]   ;;  %s4052_s8 = inlined_call_operand.vmem [shape: f32[8,128], index: 8, kind: input, shape index: {}]   ;;  %s4053_s9 = inlined_call_operand.hbm [shape: bf16[128,256], index: 9, kind: input, shape index: {}]   ;;  %s4054_s10 = inlined_call_operand.vmem [shape: f32[1,256], index: 10, kind: input, shape index: {}]   ;;  %s4055_s11 = inlined_call_operand.hbm [shape: bf16[256,128], index: 11, kind: input, shape index: {}]   ;;  %s4056_s12 = inlined_call_operand.hbm [shape: f32[2,8,128], index: 12, kind: output, shape index: {}]  }
   0x1   :  { %4086 = sst [smem:[#allocation37_spill]] %s4045_s1 }
   0x2   :  { %4087 = sst [smem:[#allocation38_spill]] %s4047_s3 }
   0x3   :  { %4088 = sst [smem:[#allocation39_spill]] %s4048_s4 }
   0x4   :  { %4089 = sst [smem:[#allocation40_spill]] %s4050_s6 }
   0x5   :  { %4090 = sst [smem:[#allocation41_spill]] %s4052_s8 }
   0x6   :  { %4091 = sst [smem:[#allocation42_spill]] %s4053_s9 }
   0x7   :  { %4092 = sst [smem:[#allocation43_spill]] %s4054_s10 }
   0x8   :  { %4093 = sst [smem:[#allocation44_spill]] %s4056_s12 }
   0x9   :  { %17 = vsyncpa [#allocation7], 0 }
   0xa   :  { %19 = vsyncpa [#allocation7 + $0x1], 0 }
   0xb   :  { %20 = vsyncpa [#allocation10], 0 }
   0xc   :  { %22 = vsyncpa [#allocation10 + $0x1], 0 }
   0xd   :  { %23 = vsyncpa [#allocation13], 0 }
   0xe   :  { %24 = vsyncpa [#allocation16], 0 }
   0xf   :  { %25 = vsyncpa [#allocation19], 0 }
  0x10   :  { %26 = vsyncpa [#allocation8], 0 }
  0x11   :  { %28 = vsyncpa [#allocation8 + $0x1], 0  ;;  %s3338_s21 = smov 0   ;;  %s3340_s22 = smov 0  }
  0x12   :  { %s3342_s23 = smov 0   ;;  %s3344_s24 = smov 0  }
  0x13   :  { %s3346_s25 = smov 0   ;;  %s3348_s26 = smov 0  }
  0x14 LB: > { %4094 = sst [smem:[#allocation28_spill]] %s3230_s21  ;;  %s3369_s27 = sadd.s32 4294967295, %s3250_s26   ;;  %s3250_s26 = sphi %s3348_s26, %s34_s26   ;;  %s3246_s25 = sphi %s3346_s25, %s4147_s25   ;;  %s3242_s24 = sphi %s3344_s24, %s4146_s24   ;;  %s3238_s23 = sphi %s3342_s23, %s4150_s23   ;;  %s3234_s22 = sphi %s3340_s22, %s4149_s22   ;;  %s3230_s21 = sphi %s3338_s21, %s4148_s21  }
  0x15   : > { %4095 = sst [smem:[#allocation29_spill]] %s3242_s24  ;;  %p2328_p0 = scmp.ge.s32.totalorder %s3250_s26, 1 }
  0x16   : > { %4096 = sst [smem:[#allocation30_spill]] %s3246_s25  ;;  %p4061_p1 = scmp.eq.s32.totalorder %s3369_s27, 0 }
  0x17   : > { %4097 = sst [smem:[#allocation31_spill]] %s3250_s26  ;;  %p366_p2 = scmp.lt.s32.totalorder %s3250_s26, 3 }
  0x18   : > { %s3252_s29 = smov [#allocation12]   ;;  %s3253_s14 = smov [#allocation15]  }
  0x19   : > { %p3374_p3 = pnand %p2328_p0, %p366_p2  ;;  %s378_s30 = sshll.u32 %s3252_s29, 4  ;;  %s3378_s30 = int_to_ptr.vmem [resolvable:$true] %s378_s30 }
  0x1a   : > { %s404_s15 = sshll.u32 %s3253_s14, 4  ;;  %s3254_s16 = smov [#allocation18]   ;;  %s3389_s15 = int_to_ptr.vmem [resolvable:$true] %s404_s15 }
  0x1b   : > { %s4098_s28 = scalar_select %p3374_p3, 1, 0 }
  0x1c   : > { %p2677_p4 = pneg %p3374_p3  ;;  %s3391_s17 = sshll.u32 %s3254_s16, 4  ;;  %s434_s17 = int_to_ptr.vmem [resolvable:$true] %s3391_s17 }
  0x1d   : > { %4099 = sst [smem:[#allocation32_spill]] %s4098_s28  ;;  %s4101_s4 = sld [smem:[#allocation39_spill]] }
  0x1e   : > { %p3385_p6 = pnand %p2677_p4, %p4061_p1 }
  0x20   : > { %s4100_s13 = scalar_select %p3385_p6, 1, 0 }
  0x21   : > { %p3401_p8 = pneg %p3385_p6 }
  0x23   : > { %s2894_s20 = scalar_lea.hbm %s4101_s4, 1024 }
  0x24   : > { %p2895_p7 = scmp.ne.s32.totalorder %s4101_s4, %s2894_s20  ;;  %p2901_p11 = scmp.lt.u32.totalorder %s2894_s20, %s4101_s4 }
  0x25   : > { %s4102_s10 = scalar_select %p3401_p8, 1, 0 }
  0x26   : > { %p2897_p9 = pnand %p3401_p8, %p2895_p7 }
  0x28   : > { %p2898_p10 = pneg %p2897_p9 }
  0x2a   : > { %p2903_p12 = pnand %p2901_p11, %p2898_p10 }
  0x2c   : > { %2906 = shalt.err (!%p2903_p12)
}
  0x2d   : > { %s2907_s12 = scalar_lea.vmem %s3378_s30, 1024  ;;  %p2915_p4 = scmp.lt.s32.totalorder %s3378_s30, %s3378_s30 }
  0x2e   : > { %p2908_p13 = scmp.ne.s32.totalorder %s3378_s30, %s2907_s12  ;;  %p2916_p5 = scmp.lt.s32.totalorder %s2907_s12, %s2907_s12 }
  0x30   : > { %p2910_p0 = pnand %p2908_p13, %p3401_p8  ;;  %p2917_p7 = por %p2916_p5, %p2915_p4 }
  0x32   : > { %p2911_p2 = pneg %p2910_p0 }
  0x34   : > { %p2918_p9 = pnand %p2917_p7, %p2911_p2 }
  0x36   : > { %2921 = shalt.err (!%p2918_p9)
}
  0x37   : > { %s4063_s18 = smov 64   ;;  %s4065_s19 = smov 4  }
  0x38   : > { %2680 = dma.hbm_to_vmem [thread:$0]  (!%p3385_p6), %s4101_s4, 1024, %s3378_s30, [#allocation13], %s4063_s18, %s4063_s18, %s4065_s19  }
  0x39   : > { %s4103_s6 = sld [smem:[#allocation40_spill]] }
  0x3f   : > { %s2922_s12 = scalar_lea.hbm %s4103_s6, 1024 }
  0x40   : > { %p2923_p5 = scmp.ne.s32.totalorder %s4103_s6, %s2922_s12  ;;  %p2929_p12 = scmp.lt.u32.totalorder %s2922_s12, %s4103_s6 }
  0x42   : > { %p2925_p10 = pnand %p2923_p5, %p3401_p8 }
  0x44   : > { %p2926_p11 = pneg %p2925_p10 }
  0x46   : > { %p2931_p13 = pnand %p2929_p12, %p2926_p11 }
  0x48   : > { %2934 = shalt.err (!%p2931_p13)
}
  0x49   : > { %s2935_s30 = scalar_lea.vmem %s3389_s15, 1024  ;;  %p2943_p7 = scmp.lt.s32.totalorder %s3389_s15, %s3389_s15 }
  0x4a   : > { %p2936_p0 = scmp.ne.s32.totalorder %s3389_s15, %s2935_s30  ;;  %p2944_p9 = scmp.lt.s32.totalorder %s2935_s30, %s2935_s30 }
  0x4c   : > { %p2938_p2 = pnand %p2936_p0, %p3401_p8  ;;  %p2945_p5 = por %p2944_p9, %p2943_p7 }
  0x4e   : > { %p2939_p4 = pneg %p2938_p2 }
  0x50   : > { %p2946_p10 = pnand %p2945_p5, %p2939_p4 }
  0x52   : > { %2949 = shalt.err (!%p2946_p10)
}
  0x53   : > { %2686 = dma.hbm_to_vmem [thread:$0]  (!%p3385_p6), %s4103_s6, 1024, %s3389_s15, [#allocation16], %s4063_s18, %s4063_s18, %s4065_s19  }
  0x54   : > { %s4104_s9 = sld [smem:[#allocation42_spill]] }
  0x5a   : > { %s2950_s20 = scalar_lea.hbm %s4104_s9, 2048 }
  0x5b   : > { %p2951_p11 = scmp.ne.s32.totalorder %s4104_s9, %s2950_s20  ;;  %p2957_p0 = scmp.lt.u32.totalorder %s2950_s20, %s4104_s9 }
  0x5d   : > { %p2953_p12 = pnand %p2951_p11, %p3401_p8 }
  0x5f   : > { %p2954_p13 = pneg %p2953_p12 }
  0x61   : > { %p2959_p2 = pnand %p2957_p0, %p2954_p13 }
  0x63   : > { %2962 = shalt.err (!%p2959_p2)
}
  0x64   : > { %s2963_s30 = scalar_lea.vmem %s434_s17, 2048  ;;  %p2971_p5 = scmp.lt.s32.totalorder %s434_s17, %s434_s17 }
  0x65   : > { %p2964_p4 = scmp.ne.s32.totalorder %s434_s17, %s2963_s30  ;;  %p2972_p10 = scmp.lt.s32.totalorder %s2963_s30, %s2963_s30 }
  0x67   : > { %p2966_p7 = pnand %p2964_p4, %p3401_p8  ;;  %p2973_p1 = por %p2972_p10, %p2971_p5 }
  0x69   : > { %p2967_p9 = pneg %p2966_p7 }
  0x6b   : > { %p2974_p3 = pnand %p2973_p1, %p2967_p9 }
  0x6d   : > { %2977 = shalt.err (!%p2974_p3)
}
  0x6e   : > { %s3257_s15 = smov 128   ;;  %s3258_s3 = smov 8  }
  0x6f   : > { %2692 = dma.hbm_to_vmem [thread:$0]  (!%p3385_p6), %s4104_s9, 2048, %s434_s17, [#allocation19], %s3257_s15, %s3257_s15, %s3258_s3  }
  0x70   : > { %s2327_s28 = sadd.s32 4294967294, %s3250_s26   ;;  %s53_s20 = sadd.s32 1, %s3246_s25 }
  0x71   : > { %s62_s29 = sadd.s32 1, %s3238_s23  ;;  %p55_p1 = scmp.ge.s32.totalorder %s53_s20, 2 }
  0x72   : > { %p69_p3 = scmp.ne.s32.totalorder %s3238_s23, %s3234_s22  ;;  %p70_p11 = scmp.eq.s32.totalorder %s3250_s26, 0 }
  0x73   : > { %p75_p12 = scmp.ne.s32.totalorder %s3234_s22, %s3230_s21  ;;  %s4152_s20 = smov (%p55_p1, %s53_s20), 0 }
  0x74   : > { %4105 = sst [smem:[#allocation33_spill]] %s4152_s20  ;;  %p3480_p13 = por %p70_p11, %p69_p3 }
  0x75   : > { %p4107_p0 = scmp.eq.s32.totalorder %s3369_s27, 0  ;;  %s57_s16 = ssub.s32 %s3246_s25, %s4152_s20 }
  0x76   : > { %p353_p4 = scmp.eq.s32.totalorder %s3369_s27, 1  ;;  %p60_p7 = scmp.eq.s32.totalorder %s57_s16, 0 }
  0x77   : > { %p3486_p2 = por %p4107_p0, %p75_p12  ;;  %p359_p9 = scmp.eq.s32.totalorder %s2327_s28, 1 }
  0x78   : > { %p3493_p5 = por %p353_p4, %p69_p3  ;;  %p2716_p10 = scmp.lt.s32.totalorder %s3250_s26, 2 }
  0x79   : > { %s4108_s17 = scalar_select %p3486_p2, 1, 0 }
  0x7a   : > { %s4109_s12 = scalar_select %p3493_p5, 1, 0 }
  0x7b   : > { %s3499_s30 = scalar_select %p60_p7, %s3238_s23, %s62_s29  }
  0x7c   : > { %4110 = sst [smem:[#allocation34_spill]] %s4109_s12  ;;  %p3501_p1 = por %p359_p9, %p75_p12 }
  0x7d   : > { %4111 = sst [smem:[#allocation35_spill]] %s3499_s30  ;;  %s4067_s3 = sand.u32 1, %s3238_s23  }
  0x7e   : > { %s4112_s15 = scalar_select %p3501_p1, 1, 0 }
  0x7f   : > { %s3508_s8 = sshll.u32 %s4067_s3, 3  ;;  %s3511_s24 = sshll.u32 %s3246_s25, 7 }
  0x80   : > { %4113 = sst [smem:[#allocation36_spill]] %s4112_s15  ;;  %p3515_p3 = pnand %p2716_p10, %p3480_p13 }
  0x81   : > { %s482_s29 = sand.u32 1, %s3250_s26   ;;  %s4115_s1 = sld [smem:[#allocation37_spill]] }
  0x82   : > { %s4114_s28 = scalar_select %p3515_p3, 1, 0 }
  0x83   : > { %s486_s3 = scalar_lea.vmem [#allocation9], %s3508_s8  ;;  %s3259_s14 = smov [#allocation14]  }
  0x84   : > { %s495_s4 = sshll.u32 %s486_s3, 4  ;;  %s3529_s6 = sshll.u32 %s3259_s14, 4  ;;  %s3527_s4 = int_to_ptr.vmem [resolvable:$true] %s495_s4  ;;  %s392_s6 = int_to_ptr.vmem [resolvable:$true] %s3529_s6 }
  0x85   : > { %s3531_s9 = scalar_lea.sflag [#allocation10], %s482_s29  ;;  %p3537_p12 = pneg %p3515_p3 }
  0x87   : > { %s3524_s19 = scalar_lea.hbm %s4115_s1, %s3511_s24  ;;  %s2983_s25 = scalar_lea.hbm %s4115_s1, 256 }
  0x88   : > { %s2978_s20 = scalar_lea.hbm %s3524_s19, 128  ;;  %p2984_p4 = scmp.lt.u32.totalorder %s3524_s19, %s4115_s1 }
  0x89   : > { %p2979_p11 = scmp.ne.s32.totalorder %s3524_s19, %s2978_s20  ;;  %p2985_p7 = scmp.lt.u32.totalorder %s2983_s25, %s2978_s20 }
  0x8a   : > { %s4116_s18 = scalar_select %p3537_p12, 1, 0 }
  0x8b   : > { %p2981_p13 = pnand %p3537_p12, %p2979_p11  ;;  %p2986_p9 = por %p2985_p7, %p2984_p4 }
  0x8c   : > { %p2987_p10 = scmp.lt.u32.totalorder %s2978_s20, %s3524_s19 }
  0x8d   : > { %p2982_p0 = pneg %p2981_p13 }
  0x8e   : > { %p2988_p1 = por %p2987_p10, %p2986_p9 }
  0x90   : > { %p2989_p5 = pnand %p2988_p1, %p2982_p0 }
  0x92   : > { %2992 = shalt.err (!%p2989_p5)
}
  0x93   : > { %s2993_s29 = scalar_lea.vmem %s3527_s4, 128  ;;  %s3260_s16 = smov [#allocation9]  }
  0x94   : > { %p2994_p11 = scmp.ne.s32.totalorder %s3527_s4, %s2993_s29  ;;  %s2998_s3 = sshll.u32 %s3260_s16, 4  ;;  %s2999_s3 = int_to_ptr.vmem [resolvable:$false] %s2998_s3 }
  0x95   : > { %s3000_s30 = scalar_lea.vmem %s2999_s3, 256  ;;  %p3001_p6 = scmp.lt.s32.totalorder %s3527_s4, %s2999_s3 }
  0x96   : > { %p2996_p13 = pnand %p2994_p11, %p3537_p12  ;;  %p3002_p8 = scmp.lt.s32.totalorder %s3000_s30, %s2993_s29 }
  0x98   : > { %p2997_p2 = pneg %p2996_p13  ;;  %p3003_p4 = por %p3002_p8, %p3001_p6 }
  0x9a   : > { %p3004_p7 = pnand %p3003_p4, %p2997_p2 }
  0x9c   : > { %3007 = shalt.err (!%p3004_p7)
}
  0x9d   : > { %s4117_s25 = smov 4   ;;  %s4118_s20 = smov 64  }
  0x9e   : > { %2702 = dma.hbm_to_vmem [thread:$0]  (!%p3515_p3), %s3524_s19, 128, %s3527_s4, %s3531_s9, %s4118_s20, %s4118_s20, %s4117_s25  }
  0x9f   : > { %s3008_s3 = scalar_lea.hbm %s4049_s5, 1024  ;;  %p4119_p8 = scmp.ne.s32.totalorder %s4102_s10, 0 }
  0xa0   : > { %p3009_p6 = scmp.ne.s32.totalorder %s4049_s5, %s3008_s3  ;;  %p3015_p1 = scmp.lt.u32.totalorder %s3008_s3, %s4049_s5 }
  0xa2   : > { %p3011_p2 = pnand %p3009_p6, %p4119_p8 }
  0xa4   : > { %p3012_p5 = pneg %p3011_p2 }
  0xa6   : > { %p3017_p0 = pnand %p3015_p1, %p3012_p5 }
  0xa8   : > { %3020 = shalt.err (!%p3017_p0)
}
  0xa9   : > { %s3021_s15 = scalar_lea.vmem %s392_s6, 1024  ;;  %p3029_p13 = scmp.lt.s32.totalorder %s392_s6, %s392_s6 }
  0xaa   : > { %p3022_p9 = scmp.ne.s32.totalorder %s392_s6, %s3021_s15  ;;  %p3030_p4 = scmp.lt.s32.totalorder %s3021_s15, %s3021_s15 }
  0xac   : > { %p3024_p10 = pnand %p3022_p9, %p4119_p8  ;;  %p3031_p7 = por %p3030_p4, %p3029_p13 }
  0xae   : > { %p3025_p11 = pneg %p3024_p10 }
  0xb0   : > { %p3032_p3 = pnand %p3031_p7, %p3025_p11 }
  0xb2   : > { %3035 = shalt.err (!%p3032_p3)
}
  0xb3   : > { %p4120_p6 = scmp.ne.s32.totalorder %s4100_s13, 0  ;;  %s3261_s26 = smov [#allocation17]  }
  0xb4   : > { %s417_s19 = sshll.u32 %s3261_s26, 4  ;;  %s3262_s14 = smov [#allocation20]   ;;  %s418_s19 = int_to_ptr.vmem [resolvable:$true] %s417_s19 }
  0xb5   : > { %2683 = dma.hbm_to_vmem [thread:$0]  (!%p4120_p6), %s4049_s5, 1024, %s392_s6, [#allocation13], %s4118_s20, %s4118_s20, %s4117_s25  }
  0xb6   : > { %s449_s16 = sshll.u32 %s3262_s14, 4  ;;  %s3036_s29 = scalar_lea.hbm %s4051_s7, 1024  ;;  %s450_s16 = int_to_ptr.vmem [resolvable:$true] %s449_s16 }
  0xb7   : > { %p3037_p3 = scmp.ne.s32.totalorder %s4051_s7, %s3036_s29  ;;  %p3043_p1 = scmp.lt.u32.totalorder %s3036_s29, %s4051_s7 }
  0xb9   : > { %p3039_p2 = pnand %p3037_p3, %p4119_p8 }
  0xbb   : > { %p3040_p5 = pneg %p3039_p2 }
  0xbd   : > { %p3045_p0 = pnand %p3043_p1, %p3040_p5 }
  0xbf   : > { %3048 = shalt.err (!%p3045_p0)
}
  0xc0   : > { %s3049_s6 = scalar_lea.vmem %s418_s19, 1024  ;;  %p3057_p13 = scmp.lt.s32.totalorder %s418_s19, %s418_s19 }
  0xc1   : > { %p3050_p9 = scmp.ne.s32.totalorder %s418_s19, %s3049_s6  ;;  %p3058_p4 = scmp.lt.s32.totalorder %s3049_s6, %s3049_s6 }
  0xc3   : > { %p3052_p10 = pnand %p3050_p9, %p4119_p8  ;;  %p3059_p7 = por %p3058_p4, %p3057_p13 }
  0xc5   : > { %p3053_p11 = pneg %p3052_p10 }
  0xc7   : > { %p3060_p12 = pnand %p3059_p7, %p3053_p11 }
  0xc9   : > { %3063 = shalt.err (!%p3060_p12)
}
  0xca   : > { %2689 = dma.hbm_to_vmem [thread:$0]  (!%p4120_p6), %s4051_s7, 1024, %s418_s19, [#allocation16], %s4118_s20, %s4118_s20, %s4117_s25  }
  0xcb   : > { %s3064_s14 = scalar_lea.hbm %s4055_s11, 2048 }
  0xcc   : > { %p3065_p3 = scmp.ne.s32.totalorder %s4055_s11, %s3064_s14  ;;  %p3071_p5 = scmp.lt.u32.totalorder %s3064_s14, %s4055_s11 }
  0xce   : > { %p3067_p12 = pnand %p3065_p3, %p4119_p8 }
  0xd0   : > { %p3068_p2 = pneg %p3067_p12 }
  0xd2   : > { %p3073_p1 = pnand %p3071_p5, %p3068_p2 }
  0xd4   : > { %3076 = shalt.err (!%p3073_p1)
}
  0xd5   : > { %s3077_s1 = scalar_lea.vmem %s450_s16, 2048  ;;  %p3085_p11 = scmp.lt.s32.totalorder %s450_s16, %s450_s16 }
  0xd6   : > { %p3078_p0 = scmp.ne.s32.totalorder %s450_s16, %s3077_s1  ;;  %p3086_p13 = scmp.lt.s32.totalorder %s3077_s1, %s3077_s1 }
  0xd8   : > { %p3080_p9 = pnand %p3078_p0, %p4119_p8  ;;  %p3087_p4 = por %p3086_p13, %p3085_p11 }
  0xda   : > { %p3081_p10 = pneg %p3080_p9 }
  0xdc   : > { %p3088_p7 = pnand %p3087_p4, %p3081_p10 }
  0xde   : > { %3091 = shalt.err (!%p3088_p7)
}
  0xdf   : > { %2695 = dma.hbm_to_vmem [thread:$0]  (!%p4120_p6), %s4055_s11, 2048, %s450_s16, [#allocation19], %s4118_s20, %s4118_s20, %s4117_s25  }
  0xe0   : > { %s3632_s12 = scalar_lea.hbm %s4044_s0, %s3511_s24  ;;  %s467_s13 = scalar_lea.vmem [#allocation6], %s3508_s8 }
  0xe1   : > { %s475_s4 = sshll.u32 %s467_s13, 4  ;;  %s3641_s3 = scalar_lea.hbm %s4046_s2, %s3511_s24  ;;  %s3635_s4 = int_to_ptr.vmem [resolvable:$true] %s475_s4 }
  0xe2   : > { %s4121_s15 = sand.u32 1, %s3238_s23   ;;  %s3092_s29 = scalar_lea.hbm %s3632_s12, 128 }
  0xe3   : > { %s464_s16 = scalar_lea.sflag [#allocation7], %s4121_s15  ;;  %p3093_p8 = scmp.ne.s32.totalorder %s3632_s12, %s3092_s29 }
  0xe4   : > { %p4122_p6 = scmp.ne.s32.totalorder %s4116_s18, 0  ;;  %s3097_s19 = scalar_lea.hbm %s4044_s0, 256 }
  0xe5   : > { %p3098_p2 = scmp.lt.u32.totalorder %s3632_s12, %s4044_s0  ;;  %p3099_p5 = scmp.lt.u32.totalorder %s3097_s19, %s3092_s29 }
  0xe6   : > { %p3095_p3 = pnand %p3093_p8, %p4122_p6  ;;  %p3101_p0 = scmp.lt.u32.totalorder %s3092_s29, %s3632_s12 }
  0xe7   : > { %p3100_p1 = por %p3099_p5, %p3098_p2 }
  0xe8   : > { %p3096_p12 = pneg %p3095_p3 }
  0xe9   : > { %p3102_p9 = por %p3101_p0, %p3100_p1 }
  0xeb   : > { %p3103_p10 = pnand %p3102_p9, %p3096_p12 }
  0xed   : > { %3106 = shalt.err (!%p3103_p10)
}
  0xee   : > { %s3107_s24 = scalar_lea.vmem %s3635_s4, 128  ;;  %s3263_s21 = smov [#allocation6]  }
  0xef   : > { %p3108_p11 = scmp.ne.s32.totalorder %s3635_s4, %s3107_s24  ;;  %s3112_s13 = sshll.u32 %s3263_s21, 4  ;;  %s3113_s13 = int_to_ptr.vmem [resolvable:$false] %s3112_s13 }
  0xf0   : > { %s3114_s26 = scalar_lea.vmem %s3113_s13, 256  ;;  %p3115_p7 = scmp.lt.s32.totalorder %s3635_s4, %s3113_s13 }
  0xf1   : > { %p3110_p13 = pnand %p3108_p11, %p4122_p6  ;;  %p3116_p8 = scmp.lt.s32.totalorder %s3114_s26, %s3107_s24 }
  0xf3   : > { %p3111_p4 = pneg %p3110_p13  ;;  %p3117_p3 = por %p3116_p8, %p3115_p7 }
  0xf5   : > { %p3118_p2 = pnand %p3117_p3, %p3111_p4 }
  0xf7   : > { %3121 = shalt.err (!%p3118_p2)
}
  0xf8   : > { %p4123_p12 = scmp.ne.s32.totalorder %s4114_s28, 0  ;;  %s509_s14 = scalar_lea.vmem [#allocation11], %s3508_s8 }
  0xf9   : > { %s518_s15 = sshll.u32 %s509_s14, 4  ;;  %s3122_s29 = scalar_lea.hbm %s3641_s3, 128  ;;  %s3667_s15 = int_to_ptr.vmem [resolvable:$true] %s518_s15 }
  0xfa   : > { %2699 = dma.hbm_to_vmem [thread:$0]  (!%p4123_p12), %s3632_s12, 128, %s3635_s4, %s464_s16  }
  0xfb   : > { %p3123_p5 = scmp.ne.s32.totalorder %s3641_s3, %s3122_s29  ;;  %s3127_s19 = scalar_lea.hbm %s4046_s2, 256 }
  0xfc   : > { %p3128_p9 = scmp.lt.u32.totalorder %s3641_s3, %s4046_s2  ;;  %p3129_p10 = scmp.lt.u32.totalorder %s3127_s19, %s3122_s29 }
  0xfd   : > { %p3125_p1 = pnand %p3123_p5, %p4122_p6  ;;  %p3131_p13 = scmp.lt.u32.totalorder %s3122_s29, %s3641_s3 }
  0xfe   : > { %p3130_p11 = por %p3129_p10, %p3128_p9 }
  0xff   : > { %p3126_p0 = pneg %p3125_p1 }
 0x100   : > { %p3132_p4 = por %p3131_p13, %p3130_p11 }
 0x102   : > { %p3133_p7 = pnand %p3132_p4, %p3126_p0 }
 0x104   : > { %3136 = shalt.err (!%p3133_p7)
}
 0x105   : > { %s3137_s8 = scalar_lea.vmem %s3667_s15, 128  ;;  %s3264_s12 = smov [#allocation11]  }
 0x106   : > { %p3138_p8 = scmp.ne.s32.totalorder %s3667_s15, %s3137_s8  ;;  %s3142_s4 = sshll.u32 %s3264_s12, 4  ;;  %s3143_s4 = int_to_ptr.vmem [resolvable:$false] %s3142_s4 }
 0x107   : > { %s3144_s16 = scalar_lea.vmem %s3143_s4, 256  ;;  %p3145_p5 = scmp.lt.s32.totalorder %s3667_s15, %s3143_s4 }
 0x108   : > { %p3140_p3 = pnand %p3138_p8, %p4122_p6  ;;  %p3146_p1 = scmp.lt.s32.totalorder %s3144_s16, %s3137_s8 }
 0x10a   : > { %p3141_p2 = pneg %p3140_p3  ;;  %p3147_p9 = por %p3146_p1, %p3145_p5 }
 0x10c   : > { %p3148_p10 = pnand %p3147_p9, %p3141_p2 }
 0x10e   : > { %3151 = shalt.err (!%p3148_p10)
}
 0x10f   : > { %2705 = dma.hbm_to_vmem [thread:$0]  (!%p4123_p12), %s3641_s3, 128, %s3667_s15, %s3531_s9, %s4118_s20, %s4118_s20, %s4117_s25  }
 0x110   : > { %s4124_s18 = sld [smem:[#allocation32_spill]] }
 0x116   : > { %p4125_p6 = scmp.ne.s32.totalorder %s4124_s18, 0 }
 0x117   : > { %s3697_s24 = sand.u32 (!%p4125_p6), 1, %s3234_s22   ;;  %p4126_p0 = scmp.ne.s32.totalorder (!%p4125_p6), %s4108_s17, 0 }
 0x118   : > { %539 = sbr.rel (%p4125_p6) target bundleno = 4298 (0x10ca), region = 68  ;;  %s3700_s21 = sshll.u32 (!%p4125_p6), %s3697_s24, 3 }
 0x119   : > { %s542_s28 = scalar_lea.sflag (!%p4125_p6), [#allocation7], %s3697_s24  ;;  %s545_s13 = scalar_lea.vmem (!%p4125_p6), [#allocation6], %s3700_s21 }
 0x11f   : > { %3205 = dma.done.wait (%p4126_p0), %s542_s28, 128  }
 0x120   : > { %3207 = vsyncadd (%p4126_p0), %s542_s28, 4294967168  ;;  %s550_s9 = sand.u32 1, %s3369_s27   ;;  %s554_s20 = scalar_lea.vmem [#allocation9], %s3700_s21 }
 0x121   : > { %s551_s25 = scalar_lea.sflag [#allocation10], %s550_s9 }
 0x122   : > { %3209 = dma.done.wait (%p4126_p0), %s551_s25, 256  }
 0x123   : > { %3211 = vsyncadd (%p4126_p0), %s551_s25, 4294967040  ;;  %s563_s3 = scalar_lea.vmem [#allocation11], %s3700_s21  ;;  %p4127_p12 = scmp.eq.s32.totalorder %s3369_s27, 0 }
 0x125   : > { %3213 = dma.done.wait (%p4127_p12), [#allocation13], 2048   ;;  %p4128_p11 = pmov %p4127_p12 }
 0x127   : > { %3215 = vsyncadd (%p4128_p11), [#allocation13], 4294965248  ;;  %p4129_p13 = pmov %p4128_p11 }
 0x128   : > { %p4130_p4 = pmov %p4128_p11 }
 0x129   : > { %3217 = dma.done.wait (%p4129_p13), [#allocation16], 2048  }
 0x12a   : > { %3219 = vsyncadd (%p4130_p4), [#allocation16], 4294965248  ;;  %p4131_p7 = pmov %p4130_p4 }
 0x12b   : > { %p4132_p8 = pmov %p4130_p4 }
 0x12c   : > { %3221 = dma.done.wait (%p4131_p7), [#allocation19], 4096  }
 0x12d   : > { %3223 = vsyncadd (%p4132_p8), [#allocation19], 4294963200  ;;  %v3265_v0 = vmov 0.0   ;;  %vm3266_vm0 = vmmov 0   ;;  %v2791_v1 = vld [vmem:[#allocation12] sm:$0xff]   ;;  %v2793_v3 = vld [vmem:[#allocation12 + $0x8] sm:$0xff]   ;;  %v1077_v44 = vlaneseq }
 0x12e   : > { %2517 = vmatprep.subr.bf16.mxu0 %v3265_v0  ;;  %2537 = vmatprep.subr.bf16.mxu1 %v3265_v0  ;;  %v2792_v2 = vld [vmem:[#allocation14] sm:$0xff]   ;;  %v2794_v4 = vld [vmem:[#allocation14 + $0x8] sm:$0xff]   ;;  %v2795_v5 = vld [vmem:[#allocation12 + $0x10] sm:$0xff]   ;;  %vm793_vm1 = vcmask 261120   ;;  %vm764_vm2 = vcmask 257024   ;;  %s3267_s27 = smov 96  }
 0x12f   : > { %2533 = vmatprep.mubr.msk.bf16.mxu0 %vm3266_vm0, %v3265_v0  ;;  %2553 = vmatprep.mubr.msk.bf16.mxu1 %vm3266_vm0, %v3265_v0  ;;  %v2796_v6 = vld [vmem:[#allocation14 + $0x10] sm:$0xff]   ;;  %v2797_v7 = vld [vmem:[#allocation12 + $0x18] sm:$0xff]   ;;  %v2799_v9 = vld [vmem:[#allocation12 + $0x20] sm:$0xff]   ;;  %794 = vst.msk [vmem:[#allocation5] sm:$0xff] %vm793_vm1, %v3265_v0  ;;  %s4133_s17 = sld [smem:[#allocation29_spill]]  ;;  %v3268_v41 = vmov 0  }
 0x130   : > { %2518 = vmatpush3.bf16.msra.mxu0 %v2791_v1  ;;  %2538 = vmatpush3.bf16.msra.mxu1 %v2792_v2  ;;  %v2798_v8 = vld [vmem:[#allocation14 + $0x18] sm:$0xff]   ;;  %v2800_v10 = vld [vmem:[#allocation14 + $0x20] sm:$0xff]   ;;  %v2801_v11 = vld [vmem:[#allocation12 + $0x28] sm:$0xff]   ;;  %795 = vst.msk [vmem:[#allocation5 + $0x8] sm:$0xff] %vm793_vm1, %v3265_v0  ;;  %vm784_vm3 = vcmask 7168   ;;  %v3269_v42 = vmov -inf  }
 0x131   : > { %2519 = vmatprep.subr.bf16.mxu0 %v3265_v0  ;;  %2539 = vmatprep.subr.bf16.mxu1 %v3265_v0  ;;  %v2802_v12 = vld [vmem:[#allocation14 + $0x28] sm:$0xff]   ;;  %v2803_v13 = vld [vmem:[#allocation12 + $0x30] sm:$0xff]   ;;  %v2805_v15 = vld [vmem:[#allocation12 + $0x38] sm:$0xff]   ;;  %796 = vst.msk [vmem:[#allocation5 + $0x10] sm:$0xff] %vm793_vm1, %v3265_v0  ;;  %s4134_s29 = sld [smem:[#allocation38_spill]]  ;;  %v3813_v46 = vshrl.u32 %v1077_v44, 7 }
 0x132   : > { %v2804_v14 = vld [vmem:[#allocation14 + $0x30] sm:$0xff]   ;;  %v2806_v17 = vld [vmem:[#allocation14 + $0x38] sm:$0xff]   ;;  %v2807_v18 = vld [vmem:[%s554_s20] sm:$0xff]   ;;  %797 = vst.msk [vmem:[#allocation5 + $0x18] sm:$0xff] %vm793_vm1, %v3265_v0  ;;  %2789 = vset.pattern.permute.xlu0 %v3268_v41  ;;  %2790 = vset.pattern.permute.xlu1 %v3268_v41  ;;  %vm1084_vm6 = vcmask 130048   ;;  %s3270_s1 = smov 64  }
 0x133   : > { %v657_v16 = vld [vmem:[%s545_s13] sm:$0xff]  ;;  %v2808_v20 = vld [vmem:[#allocation15] sm:$0xff]   ;;  %v2809_v21 = vld [vmem:[#allocation15 + $0x8] sm:$0xff]   ;;  %785 = vst.msk [vmem:[#allocation3] sm:$0xff] %vm784_vm3, %v3269_v42  ;;  %v1079_v47 = vsub.s32 0, %v3813_v46  ;;  %s3271_s19 = smov 32  }
 0x134   : > { %2520 = vmatpush3.bf16.msra.mxu0 %v2793_v3  ;;  %2540 = vmatpush3.bf16.msra.mxu1 %v2794_v4  ;;  %v658_v19 = vpack.c.bf16 %v657_v16, %v657_v16  ;;  %v2810_v23 = vld [vmem:[#allocation15 + $0x10] sm:$0xff]   ;;  %v2811_v33 = vld [vmem:[#allocation15 + $0x18] sm:$0xff]   ;;  %v2812_v35 = vld [vmem:[#allocation15 + $0x20] sm:$0xff]   ;;  %786 = vst.msk [vmem:[#allocation3 + $0x8] sm:$0xff] %vm784_vm3, %v3269_v42  ;;  %vm1618_vm7 = vcmask 523264   ;;  %vm1620_vm8 = vcmask 785408  }
 0x135   : > { %2521 = vmatprep.subr.bf16.mxu0 %v3265_v0  ;;  %2541 = vmatprep.subr.bf16.mxu1 %v3265_v0  ;;  %v2813_v37 = vld [vmem:[#allocation15 + $0x28] sm:$0xff]   ;;  %v2814_v38 = vld [vmem:[#allocation15 + $0x30] sm:$0xff]   ;;  %v2815_v39 = vld [vmem:[#allocation15 + $0x38] sm:$0xff]   ;;  %787 = vst.msk [vmem:[#allocation3 + $0x10] sm:$0xff] %vm784_vm3, %v3269_v42  ;;  %p646_p3 = scmp.lt.s32.totalorder %s4133_s17, 1  ;;  %s4135_s8 = sld [smem:[#allocation41_spill]] }
 0x136   : > { %v2816_v40 = vld [vmem:[%s563_s3] sm:$0xff]   ;;  %788 = vst.msk [vmem:[#allocation3 + $0x18] sm:$0xff] %vm784_vm3, %v3269_v42  ;;  %789 = vst.msk [vmem:[#allocation4] sm:$0xff] %vm784_vm3, %v3265_v0  ;;  %s4136_s25 = sld [smem:[#allocation43_spill]]  ;;  %s4138_s10 = sld [smem:[#allocation44_spill]] }
 0x137   : > { %790 = vst.msk [vmem:[#allocation4 + $0x8] sm:$0xff] %vm784_vm3, %v3265_v0  ;;  %791 = vst.msk [vmem:[#allocation4 + $0x10] sm:$0xff] %vm784_vm3, %v3265_v0  ;;  %s647_s26 = scalar_select %p646_p3, %s4133_s17, 1 }
 0x138   : > { %2522 = vmatpush3.bf16.msra.mxu0 %v2795_v5  ;;  %2542 = vmatpush3.bf16.msra.mxu1 %v2796_v6  ;;  %792 = vst.msk [vmem:[#allocation4 + $0x18] sm:$0xff] %vm784_vm3, %v3265_v0  ;;  %s2111_s4 = scalar_lea.sflag [#allocation8], %s3697_s24 }
 0x139   : > { %2523 = vmatprep.subr.bf16.mxu0 %v3265_v0  ;;  %2543 = vmatprep.subr.bf16.mxu1 %v3265_v0  ;;  %s651_s30 = scalar_lea.vmem %s4134_s29, %s647_s26  ;;  %s4137_s26 = sld [smem:[#allocation34_spill]] }
 0x13a   : > { %v1026_v45 = vld [vmem:[%s651_s30] sm:$0x1]  ;;  %v3829_v61 = vld [vmem:[#allocation3] sm:$0xff]  ;;  %s2437_s29 = sshll.u32 %s4133_s17, 7  ;;  %s643_s30 = scalar_lea.vmem [#allocation21], %s3700_s21 }
 0x13b   : > { %vm1027_vm4 = vcmp.eq.s32.totalorder %v1026_v45, 0  ;;  %s3272_s21 = smov [#allocation21]  }
 0x13c   : > { %2524 = vmatpush3.bf16.msra.mxu0 %v2797_v7  ;;  %2544 = vmatpush3.bf16.msra.mxu1 %v2798_v8  ;;  %v1076_v48 = vsel %vm1027_vm4, 1, %v3268_v41  ;;  %s3995_s12 = scalar_lea.hbm %s4138_s10, %s2437_s29  ;;  %s3156_s17 = sshll.u32 %s3272_s21, 4  ;;  %s3157_s17 = int_to_ptr.vmem [resolvable:$false] %s3156_s17 }
 0x13d   : > { %2525 = vmatprep.subr.bf16.mxu0 %v3265_v0  ;;  %2545 = vmatprep.subr.bf16.mxu1 %v3265_v0  ;;  %v3819_v49 = vrot.slane %v1076_v48, %v1079_v47  ;;  %s3158_s18 = scalar_lea.vmem %s3157_s17, 256 }
 0x13f   : > { %vm1081_vm5 = vcmp.eq.s32.totalorder %v3819_v49, 1  ;;  %v1232_v49 = vld [vmem:[#allocation4 + $0x8] sm:$0xff]  ;;  %p4139_p5 = scmp.ne.s32.totalorder %s4137_s26, 0 }
 0x140   : > { %2526 = vmatpush3.bf16.msra.mxu0 %v2799_v9  ;;  %2546 = vmatpush3.bf16.msra.mxu1 %v2800_v10 }
 0x141   : > { %2527 = vmatprep.subr.bf16.mxu0 %v3265_v0  ;;  %2547 = vmatprep.subr.bf16.mxu1 %v3265_v0 }
 0x144   : > { %2528 = vmatpush3.bf16.msra.mxu0 %v2801_v11  ;;  %2548 = vmatpush3.bf16.msra.mxu1 %v2802_v12 }
 0x145   : > { %2529 = vmatprep.subr.bf16.mxu0 %v3265_v0  ;;  %2549 = vmatprep.subr.bf16.mxu1 %v3265_v0 }
 0x148   : > { %2530 = vmatpush3.bf16.msra.mxu0 %v2803_v13  ;;  %2550 = vmatpush3.bf16.msra.mxu1 %v2804_v14 }
 0x149   : > { %2531 = vmatprep.subr.bf16.mxu0 %v3265_v0  ;;  %2551 = vmatprep.subr.bf16.mxu1 %v3265_v0 }
 0x14c   : > { %2532 = vmatpush3.bf16.msra.mxu0 %v2805_v15  ;;  %2552 = vmatpush3.bf16.msra.mxu1 %v2806_v17 }
 0x14d   : > { %2557 = vmatprep.subr.bf16.mxu0 %v3265_v0  ;;  %2577 = vmatprep.subr.bf16.mxu1 %v3265_v0 }
 0x14f   : > { %2534 = vmatmul.mubr.bf16.vlgmr.msra.gmra.mrb[0].mxu0 %v658_v19  ;;  %2554 = vmatmul.mubr.bf16.vlgmr.msra.gmra.mrb[0].mxu1 %v2807_v18 }
 0x150   : > { %2573 = vmatprep.mubr.msk.bf16.mxu0 %vm3266_vm0, %v3265_v0  ;;  %2579 = vmatprep.mubr.msk.bf16.mxu1 %vm3266_vm0, %v3265_v0 }
 0x151   : > { %2558 = vmatpush3.bf16.msra.mxu0 %v2808_v20 }
 0x152   : > { %2559 = vmatprep.subr.bf16.mxu0 %v3265_v0 }
 0x155   : > { %2560 = vmatpush3.bf16.msra.mxu0 %v2809_v21 }
 0x156   : > { %2561 = vmatprep.subr.bf16.mxu0 %v3265_v0 }
 0x159   : > { %2562 = vmatpush3.bf16.msra.mxu0 %v2810_v23 }
 0x15a   : > { %2563 = vmatprep.subr.bf16.mxu0 %v3265_v0 }
 0x15d   : > { %2564 = vmatpush3.bf16.msra.mxu0 %v2811_v33 }
 0x15e   : > { %2565 = vmatprep.subr.bf16.mxu0 %v3265_v0 }
 0x161   : > { %2566 = vmatpush3.bf16.msra.mxu0 %v2812_v35 }
 0x162   : > { %2567 = vmatprep.subr.bf16.mxu0 %v3265_v0 }
 0x165   : > { %2568 = vmatpush3.bf16.msra.mxu0 %v2813_v37 }
 0x166   : > { %2569 = vmatprep.subr.bf16.mxu0 %v3265_v0 }
 0x169   : > { %2570 = vmatpush3.bf16.msra.mxu0 %v2814_v38 }
 0x16a   : > { %2571 = vmatprep.subr.bf16.mxu0 %v3265_v0 }
 0x16d   : > { %2572 = vmatpush3.bf16.msra.mxu0 %v2815_v39 }
 0x16e   : > { %2625 = vmatprep.subr.bf16.mxu0 %v3265_v0 }
 0x170   : > { %2574 = vmatmul.mubr.bf16.vlgmr.msra.gmra.mrb[4].mxu0 %v2816_v40 }
 0x171   : > { %2641 = vmatprep.mubr.msk.bf16.mxu0 %vm3266_vm0, %v3265_v0 }
 0x222   : > { %v757_v22 = vpop.f32.mrb[0].mxu0  ;;  %v904_v25 = vpop.f32.mrb[0].mxu1 }
 0x223   : > { %v3766_v24 = vpack.c.bf16 %v757_v22, %v757_v22  ;;  %v2535_v26 = vpop.f32.mrb[1].mxu0  ;;  %v2555_v27 = vpop.f32.mrb[1].mxu1  ;;  %v3864_v22 = vld [vmem:[#allocation3 + $0x8] sm:$0xff] }
 0x224   : > { %v760_v28 = vpop.f32.mrb[2].mxu0  ;;  %v907_v29 = vpop.f32.mrb[2].mxu1 }
 0x225   : > { %765 = vst.msk [vmem:[#allocation2] sm:$0xf] %vm764_vm2, %v3766_v24  ;;  %769 = vrot.lane.b32.xlu1 %v3766_v24, %s3267_s27  ;;  %v2536_v30 = vpop.f32.mrb[3].mxu0  ;;  %v3773_v31 = vpack.c.bf16 %v907_v29, %v904_v25  ;;  %v2556_v32 = vpop.f32.mrb[3].mxu1 }
 0x227   : > { %v1034_v34 = vsel %vm793_vm1, %v3773_v31, 0 }
 0x228   : > { %2578 = vmatpush3.bf16.xpose.msra.mxu1 %v1034_v34 }
 0x229   : > { %1165 = vrot.lane.b32.xlu1 %v3773_v31, %s3267_s27  ;;  %2583 = vmatprep.subr.bf16.mxu1 %v3265_v0 }
 0x22c   : > { %v1028_v36 = vld [vmem:[#allocation2] sm:$0xf] }
 0x22f   : > { %2580 = vmatmul.mubr.msk.bf16.vlgmr.msra.gmra.mrb[4].mxu1 %vm793_vm1, %v1028_v36 }
 0x230   : > { %2585 = vmatprep.mubr.msk.bf16.mxu1 %vm3266_vm0, %v3265_v0 }
 0x243   : > { %v1018_v56 = vpop.f32.mrb[4].mxu0 }
 0x244   : > { %v2575_v57 = vpop.f32.mrb[5].mxu0 }
 0x245   : > { %v1021_v58 = vpop.f32.mrb[6].mxu0 }
 0x246   : > { %v3825_v59 = vpack.c.bf16 %v1021_v58, %v1018_v56  ;;  %v2576_v60 = vpop.f32.mrb[7].mxu0 }
 0x248   : > { %2584 = vmatpush3.bf16.msra.mxu1 %v3825_v59 }
 0x249   : > { %2589 = vmatprep.subr.bf16.mxu1 %v3265_v0 }
 0x297   : > { %v770_v43 = vpop.permute.xlu1 %769 }
 0x298   : > { %773 = vst.msk [vmem:[#allocation2 + $0x4] sm:$0xf] %vm764_vm2, %v770_v43 }
 0x29b   : > { %v1166_v8 = vpop.permute.xlu1 %1165 }
 0x29c   : > { %v1171_v10 = vsel %vm793_vm1, %v1166_v8, 0 }
 0x29f   : > { %v1163_v11 = vld [vmem:[#allocation2 + $0x4] sm:$0xf] }
 0x302   : > { %v1070_v50 = vpop.f32.mrb[4].mxu1 }
 0x303   : > { %v1082_v51 = vsel %vm1081_vm5, -8.838835e+18, %v1070_v50  ;;  %v2581_v52 = vpop.f32.mrb[5].mxu1  ;;  %v3891_v50 = vld [vmem:[#allocation3 + $0x10] sm:$0xff] }
 0x304   : > { %v1073_v53 = vpop.f32.mrb[6].mxu1  ;;  %v1085_v54 = vsel %vm1084_vm6, %v1082_v51, -inf }
 0x305   : > { %1086 = vmax.xlane.f32.xlu0 %v1085_v54  ;;  %v2582_v55 = vpop.f32.mrb[7].mxu1 }
 0x392   : > { %v1087_v62 = vpop.xlane.xlu0 %1086 }
 0x393   : > { %v3832_v63 = vmax.f32 %v3829_v61, %v1087_v62 }
 0x395   : > { %v1089_v1 = vsub.f32 %v3829_v61, %v3832_v63  ;;  %1161 = vst.msk [vmem:[#allocation3] sm:$0xff] %vm784_vm3, %v3832_v63  ;;  %1094 = vperm.xlu0 %2789, %v3832_v63  }
 0x399   : > { %1249 = vrot.lane.b32.xlu0 %v3825_v59, %s3267_s27 }
 0x39d   : > { %774 = vrot.lane.b32.xlu0 %v3766_v24, %s3270_s1 }
 0x3a1   : > { %1300 = vrot.lane.b32.xlu0 %v3773_v31, %s3270_s1 }
 0x414   : > { %v1095_v2 = vpop.permute.xlu0 %1094 }
 0x415   : > { %v1097_v3 = vsub.f32 %v1082_v51, %v1095_v2 }
 0x417   : > { %v1098_v4 = vmul.f32 1.442695, %v1097_v3 }
 0x418   : > { %v1250_v5 = vpop.permute.xlu0 %1249 }
 0x419   : > { %2865 = vpow2.f32 %v1098_v4 }
 0x41c   : > { %v775_v6 = vpop.permute.xlu0 %774 }
 0x41d   : > { %778 = vst.msk [vmem:[#allocation2 + $0x8] sm:$0xf] %vm764_vm2, %v775_v6 }
 0x420   : > { %v1301_v32 = vpop.permute.xlu0 %1300 }
 0x421   : > { %v1306_v34 = vsel %vm793_vm1, %v1301_v32, 0 }
 0x423   : > { %v3846_v7 = vpop.eup %2865 }
 0x424   : > { %v1115_v9 = vpack.c.bf16 %v3846_v7, %v3846_v7  ;;  %v1299_v35 = vld [vmem:[#allocation2 + $0x8] sm:$0xf] }
 0x426   : > { %2586 = vmatmul.mubr.msk.bf16.vlgmr.msra.gmra.mrb[8].mxu1 %vm1084_vm6, %v1115_v9 }
 0x427   : > { %2590 = vmatpush3.bf16.xpose.msra.mxu1 %v1171_v10  ;;  %2591 = vmatprep.mubr.msk.bf16.mxu1 %vm3266_vm0, %v3265_v0 }
 0x428   : > { %2595 = vmatprep.subr.bf16.mxu1 %v3265_v0 }
 0x42e   : > { %2592 = vmatmul.mubr.msk.bf16.vlgmr.msra.gmra.mrb[12].mxu1 %vm793_vm1, %v1163_v11 }
 0x42f   : > { %2596 = vmatpush3.bf16.msra.mxu1 %v1250_v5  ;;  %2597 = vmatprep.mubr.msk.bf16.mxu1 %vm3266_vm0, %v3265_v0 }
 0x430   : > { %2601 = vmatprep.subr.bf16.mxu1 %v3265_v0 }
 0x4f9   : > { %v3859_v12 = vpop.f32.mrb[8].mxu1 }
 0x4fa   : > { %v2587_v13 = vpop.f32.mrb[9].mxu1 }
 0x4fb   : > { %v1156_v14 = vpop.f32.mrb[10].mxu1 }
 0x4fc   : > { %v2588_v15 = vpop.f32.mrb[11].mxu1 }
 0x501   : > { %v1207_v16 = vpop.f32.mrb[12].mxu1 }
 0x502   : > { %v1213_v17 = vsel %vm1081_vm5, -8.838835e+18, %v1207_v16  ;;  %v2593_v18 = vpop.f32.mrb[13].mxu1 }
 0x503   : > { %v1210_v19 = vpop.f32.mrb[14].mxu1  ;;  %v1216_v20 = vsel %vm1084_vm6, %v1213_v17, -inf }
 0x504   : > { %1217 = vmax.xlane.f32.xlu1 %v1216_v20  ;;  %v2594_v21 = vpop.f32.mrb[15].mxu1 }
 0x591   : > { %v1218_v23 = vpop.xlane.xlu1 %1217 }
 0x592   : > { %v3867_v25 = vmax.f32 %v3864_v22, %v1218_v23 }
 0x594   : > { %v1220_v26 = vsub.f32 %v3864_v22, %v3867_v25  ;;  %1297 = vst.msk [vmem:[#allocation3 + $0x8] sm:$0xff] %vm784_vm3, %v3867_v25  ;;  %1225 = vperm.xlu1 %2790, %v3867_v25  }
 0x596   : > { %v1221_v16 = vmul.f32 1.442695, %v1220_v26 }
 0x613   : > { %v1226_v27 = vpop.permute.xlu1 %1225 }
 0x614   : > { %v1228_v28 = vsub.f32 %v1213_v17, %v1226_v27  ;;  %v1484_v17 = vld [vmem:[#allocation3 + $0x18] sm:$0xff] }
 0x616   : > { %v1229_v29 = vmul.f32 1.442695, %v1228_v28 }
 0x618   : > { %2867 = vpow2.f32 %v1229_v29 }
 0x622   : > { %v3874_v30 = vpop.eup %2867 }
 0x623   : > { %v1247_v33 = vpack.c.bf16 %v3874_v30, %v3874_v30  ;;  %v1234_v15 = vsel %vm1084_vm6, %v3874_v30, 0.0 }
 0x625   : > { %2598 = vmatmul.mubr.msk.bf16.vlgmr.msra.gmra.mrb[16].mxu1 %vm1084_vm6, %v1247_v33 }
 0x626   : > { %2602 = vmatpush3.bf16.xpose.msra.mxu1 %v1306_v34  ;;  %2603 = vmatprep.mubr.msk.bf16.mxu1 %vm3266_vm0, %v3265_v0 }
 0x627   : > { %2607 = vmatprep.subr.bf16.mxu1 %v3265_v0 }
 0x62d   : > { %2604 = vmatmul.mubr.msk.bf16.vlgmr.msra.gmra.mrb[20].mxu1 %vm793_vm1, %v1299_v35 }
 0x62e   : > { %2609 = vmatprep.mubr.msk.bf16.mxu1 %vm3266_vm0, %v3265_v0 }
 0x6f8   : > { %v3886_v36 = vpop.f32.mrb[16].mxu1 }
 0x6f9   : > { %v2599_v37 = vpop.f32.mrb[17].mxu1 }
 0x6fa   : > { %v1292_v38 = vpop.f32.mrb[18].mxu1 }
 0x6fb   : > { %v2600_v39 = vpop.f32.mrb[19].mxu1 }
 0x700   : > { %v1342_v40 = vpop.f32.mrb[20].mxu1 }
 0x701   : > { %v1348_v42 = vsel %vm1081_vm5, -8.838835e+18, %v1342_v40  ;;  %v2605_v43 = vpop.f32.mrb[21].mxu1 }
 0x702   : > { %v1345_v44 = vpop.f32.mrb[22].mxu1  ;;  %v1351_v45 = vsel %vm1084_vm6, %v1348_v42, -inf  ;;  %v1367_v43 = vld [vmem:[#allocation4 + $0x10] sm:$0xff] }
 0x703   : > { %1352 = vmax.xlane.f32.xlu0 %v1351_v45  ;;  %v2606_v48 = vpop.f32.mrb[23].mxu1 }
 0x790   : > { %v1353_v51 = vpop.xlane.xlu0 %1352 }
 0x791   : > { %v3894_v52 = vmax.f32 %v3891_v50, %v1353_v51  ;;  %v1501_v51 = vld [vmem:[#allocation4 + $0x18] sm:$0xff] }
 0x793   : > { %v1355_v53 = vsub.f32 %v3891_v50, %v3894_v52  ;;  %1431 = vst.msk [vmem:[#allocation3 + $0x10] sm:$0xff] %vm784_vm3, %v3894_v52  ;;  %1360 = vperm.xlu1 %2790, %v3894_v52   ;;  %v1090_v50 = vmul.f32 1.442695, %v1089_v1 }
 0x795   : > { %v1356_v38 = vmul.f32 1.442695, %v1355_v53 }
 0x797   : > { %1383 = vrot.lane.b32.xlu1 %v3825_v59, %s3270_s1 }
 0x79b   : > { %779 = vrot.lane.b32.xlu1 %v3766_v24, %s3271_s19 }
 0x79f   : > { %1434 = vrot.lane.b32.xlu1 %v3773_v31, %s3271_s19 }
 0x812   : > { %v1361_v54 = vpop.permute.xlu1 %1360 }
 0x813   : > { %v1363_v55 = vsub.f32 %v1348_v42, %v1361_v54 }
 0x815   : > { %v1364_v56 = vmul.f32 1.442695, %v1363_v55  ;;  %v1100_v55 = vld [vmem:[#allocation4] sm:$0xff] }
 0x816   : > { %v1384_v57 = vpop.permute.xlu1 %1383 }
 0x817   : > { %2869 = vpow2.f32 %v1364_v56  ;;  %2608 = vmatpush3.bf16.msra.mxu1 %v1384_v57 }
 0x818   : > { %2613 = vmatprep.subr.bf16.mxu1 %v3265_v0  ;;  %2871 = vpow2.f32 %v1221_v16  ;;  %v2817_v16 = vld [vmem:[#allocation17] sm:$0xff]  }
 0x819   : > { %2626 = vmatpush3.bf16.msra.mxu0 %v2817_v16  ;;  %v2852_v16 = vld [vmem:[#allocation20 + $0x8] sm:$0xff]  }
 0x81a   : > { %v780_v58 = vpop.permute.xlu1 %779  ;;  %2627 = vmatprep.subr.bf16.mxu0 %v3265_v0 }
 0x81b   : > { %783 = vst.msk [vmem:[#allocation2 + $0xc] sm:$0xf] %vm764_vm2, %v780_v58 }
 0x81e   : > { %v1435_v62 = vpop.permute.xlu1 %1434 }
 0x81f   : > { %v1440_v3 = vsel %vm793_vm1, %v1435_v62, 0  ;;  %v1240_v62 = vld [vmem:[#allocation5 + $0x8] sm:$0xff] }
 0x821   : > { %v2870_v60 = vpop.eup %2869 }
 0x822   : > { %v1382_v2 = vpack.c.bf16 %v2870_v60, %v2870_v60  ;;  %v1433_v24 = vld [vmem:[#allocation2 + $0xc] sm:$0xf]  ;;  %v2872_v18 = vpop.eup %2871  ;;  %v1369_v22 = vsel %vm1084_vm6, %v2870_v60, 0.0 }
 0x823   : > { %v1233_v23 = vmul.f32 %v2872_v18, %v1232_v49  ;;  %v2821_v49 = vld [vmem:[#allocation17 + $0x20] sm:$0xff]  }
 0x824   : > { %2610 = vmatmul.mubr.msk.bf16.vlgmr.msra.gmra.mrb[24].mxu1 %vm1084_vm6, %v1382_v2 }
 0x825   : > { %2614 = vmatpush3.bf16.xpose.msra.mxu1 %v1440_v3  ;;  %2615 = vmatprep.mubr.msk.bf16.mxu1 %vm3266_vm0, %v3265_v0 }
 0x826   : > { %2619 = vmatprep.subr.bf16.mxu1 %v3265_v0 }
 0x82c   : > { %2616 = vmatmul.mubr.msk.bf16.vlgmr.msra.gmra.mrb[28].mxu1 %vm793_vm1, %v1433_v24  ;;  %v1375_v24 = vld [vmem:[#allocation5 + $0x10] sm:$0xff] }
 0x82d   : > { %2621 = vmatprep.mubr.msk.bf16.mxu1 %vm3266_vm0, %v3265_v0 }
 0x8f7   : > { %v3917_v31 = vpop.f32.mrb[24].mxu1 }
 0x8f8   : > { %v2611_v4 = vpop.f32.mrb[25].mxu1 }
 0x8f9   : > { %v1426_v5 = vpop.f32.mrb[26].mxu1 }
 0x8fa   : > { %v2612_v6 = vpop.f32.mrb[27].mxu1 }
 0x8ff   : > { %v1476_v8 = vpop.f32.mrb[28].mxu1 }
 0x900   : > { %v1482_v9 = vsel %vm1081_vm5, -8.838835e+18, %v1476_v8  ;;  %v2617_v10 = vpop.f32.mrb[29].mxu1 }
 0x901   : > { %v1479_v11 = vpop.f32.mrb[30].mxu1  ;;  %v1485_v13 = vsel %vm1084_vm6, %v1482_v9, -inf }
 0x902   : > { %1486 = vmax.xlane.f32.xlu1 %v1485_v13  ;;  %v2618_v14 = vpop.f32.mrb[31].mxu1 }
 0x906   : > { %1235 = vadd.xlane.f32.xlu1 %v1234_v15 }
 0x98f   : > { %v1487_v19 = vpop.xlane.xlu1 %1486 }
 0x990   : > { %v1488_v20 = vmax.f32 %v1484_v17, %v1487_v19  ;;  %v2820_v19 = vld [vmem:[#allocation17 + $0x18] sm:$0xff]  }
 0x992   : > { %v1489_v21 = vsub.f32 %v1484_v17, %v1488_v20  ;;  %1565 = vst.msk [vmem:[#allocation3 + $0x18] sm:$0xff] %vm784_vm3, %v1488_v20  ;;  %1494 = vperm.xlu0 %2789, %v1488_v20   ;;  %v2822_v20 = vld [vmem:[#allocation17 + $0x28] sm:$0xff]  }
 0x993   : > { %v1236_v27 = vpop.xlane.xlu1 %1235 }
 0x994   : > { %v1237_v28 = vadd.f32 %v1236_v27, %v1233_v23  ;;  %v1490_v39 = vmul.f32 1.442695, %v1489_v21  ;;  %v2823_v21 = vld [vmem:[#allocation17 + $0x30] sm:$0xff]   ;;  %v1509_v23 = vld [vmem:[#allocation5 + $0x18] sm:$0xff] }
 0x996   : > { %1238 = vst.msk [vmem:[#allocation4 + $0x8] sm:$0xff] %vm784_vm3, %v1237_v28  ;;  %1517 = vrot.lane.b32.xlu0 %v3825_v59, %s3271_s19  ;;  %v1102_v59 = vsel %vm1084_vm6, %v3846_v7, 0.0 }
 0x99d   : > { %v1579_v25 = vld [vmem:[#allocation4 + $0x8] sm:$0xff] }
 0x99e   : > { %2873 = vrcp.f32 %v1579_v25 }
 0x9a8   : > { %v2874_v26 = vpop.eup %2873 }
 0x9b5   : > { %1370 = vadd.xlane.f32.xlu0 %v1369_v22 }
 0x9cb   : > { %1583 = vperm.xlu0 %2789, %v2874_v26  }
 0xa11   : > { %v1495_v29 = vpop.permute.xlu0 %1494 }
 0xa12   : > { %v1497_v30 = vsub.f32 %v1482_v9, %v1495_v29 }
 0xa14   : > { %v1498_v32 = vmul.f32 1.442695, %v1497_v30  ;;  %v2824_v30 = vld [vmem:[#allocation17 + $0x38] sm:$0xff]  }
 0xa15   : > { %v1518_v33 = vpop.permute.xlu0 %1517 }
 0xa16   : > { %2875 = vpow2.f32 %v1498_v32  ;;  %2620 = vmatpush3.bf16.msra.mxu1 %v1518_v33 }
 0xa17   : > { %2877 = vpow2.f32 %v1356_v38 }
 0xa18   : > { %2879 = vpow2.f32 %v1490_v39 }
 0xa20   : > { %v2876_v34 = vpop.eup %2875 }
 0xa21   : > { %v1503_v35 = vsel %vm1084_vm6, %v2876_v34, 0.0  ;;  %v1516_v37 = vpack.c.bf16 %v2876_v34, %v2876_v34  ;;  %v2878_v40 = vpop.eup %2877 }
 0xa22   : > { %1504 = vadd.xlane.f32.xlu1 %v1503_v35  ;;  %v2880_v42 = vpop.eup %2879  ;;  %v1368_v44 = vmul.f32 %v2878_v40, %v1367_v43  ;;  %v1108_v35 = vld [vmem:[#allocation5] sm:$0xff] }
 0xa23   : > { %2622 = vmatmul.mubr.msk.bf16.vlgmr.msra.gmra.mrb[32].mxu1 %vm1084_vm6, %v1516_v37  ;;  %v1502_v52 = vmul.f32 %v2880_v42, %v1501_v51 }
 0xa24   : > { %1902 = vmatprep.mubr.bf16.mxu1 %v3268_v41 }
 0xa26   : > { %1103 = vadd.xlane.f32.xlu1 %v1102_v59 }
 0xa37   : > { %1243 = vperm.xlu1 %2790, %v2872_v18   ;;  %v2819_v18 = vld [vmem:[#allocation17 + $0x10] sm:$0xff]  }
 0xa3b   : > { %1378 = vperm.xlu1 %2790, %v2878_v40  }
 0xa3f   : > { %1512 = vperm.xlu1 %2790, %v2880_v42  }
 0xa42   : > { %v1371_v45 = vpop.xlane.xlu0 %1370 }
 0xa43   : > { %v1372_v41 = vadd.f32 %v1371_v45, %v1368_v44 }
 0xa45   : > { %1373 = vst.msk [vmem:[#allocation4 + $0x10] sm:$0xff] %vm784_vm3, %v1372_v41 }
 0xa4a   : > { %v1584_v11 = vpop.permute.xlu0 %1583 }
 0xa4c   : > { %v1588_v7 = vld [vmem:[#allocation4 + $0x10] sm:$0xff] }
 0xa4d   : > { %2881 = vrcp.f32 %v1588_v7 }
 0xa4e   : > { %2883 = vpow2.f32 %v1090_v50 }
 0xa57   : > { %v2882_v48 = vpop.eup %2881 }
 0xa58   : > { %1592 = vperm.xlu1 %2790, %v2882_v48   ;;  %v2884_v53 = vpop.eup %2883 }
 0xa59   : > { %v1101_v57 = vmul.f32 %v2884_v53, %v1100_v55  ;;  %v2825_v55 = vld [vmem:[#allocation18] ss:$8 sps:$4 sm:$0xff]  }
 0xaaf   : > { %v1505_v54 = vpop.xlane.xlu1 %1504 }
 0xab0   : > { %v1506_v56 = vadd.f32 %v1505_v54, %v1502_v52 }
 0xab2   : > { %1507 = vst.msk [vmem:[#allocation4 + $0x18] sm:$0xff] %vm784_vm3, %v1506_v56  ;;  %v2827_v56 = vld [vmem:[#allocation18 + $0x4] ss:$8 sps:$4 sm:$0xff]  }
 0xab3   : > { %v1104_v58 = vpop.xlane.xlu1 %1103  ;;  %1870 = vmatprep.subr.bf16.mxu1 %v2827_v56 }
 0xab4   : > { %v1105_v60 = vadd.f32 %v1104_v58, %v1101_v57  ;;  %v2830_v57 = vld [vmem:[#allocation18 + $0x14] ss:$8 sps:$4 sm:$0xff]   ;;  %1871 = vmatpush1.bf16.msra.mxu1 %v2825_v55  ;;  %v2828_v58 = vld [vmem:[#allocation18 + $0x10] ss:$8 sps:$4 sm:$0xff]  }
 0xab5   : > { %1872 = vmatprep.subr.bf16.mxu1 %v2830_v57 }
 0xab6   : > { %1107 = vst.msk [vmem:[#allocation4] sm:$0xff] %vm784_vm3, %v1105_v60 }
 0xab7   : > { %v1244_v2 = vpop.permute.xlu1 %1243 }
 0xab8   : > { %v1246_v3 = vmul.f32 %v1244_v2, %v1240_v62  ;;  %1873 = vmatpush1.bf16.msra.mxu1 %v2828_v58 }
 0xab9   : > { %v1597_v61 = vld [vmem:[#allocation4 + $0x18] sm:$0xff] }
 0xaba   : > { %v1295_v63 = vadd.f32 %v3886_v36, %v1246_v3  ;;  %2885 = vrcp.f32 %v1597_v61  ;;  %v2831_v61 = vld [vmem:[#allocation18 + $0x20] ss:$8 sps:$4 sm:$0xff]  }
 0xabb   : > { %v1379_v1 = vpop.permute.xlu1 %1378 }
 0xabc   : > { %1296 = vst.msk [vmem:[#allocation5 + $0x8] sm:$0xff] %vm793_vm1, %v1295_v63  ;;  %v1381_v4 = vmul.f32 %v1379_v1, %v1375_v24  ;;  %v2833_v24 = vld [vmem:[#allocation18 + $0x24] ss:$8 sps:$4 sm:$0xff]   ;;  %v2836_v63 = vld [vmem:[#allocation18 + $0x34] ss:$8 sps:$4 sm:$0xff]  }
 0xabd   : > { %v1570_v6 = vld [vmem:[#allocation4] sm:$0xff]  ;;  %1874 = vmatprep.subr.bf16.mxu1 %v2833_v24 }
 0xabe   : > { %v1429_v5 = vadd.f32 %v3917_v31, %v1381_v4  ;;  %2887 = vrcp.f32 %v1570_v6  ;;  %v2818_v31 = vld [vmem:[#allocation17 + $0x8] sm:$0xff]   ;;  %1875 = vmatpush1.bf16.msra.mxu1 %v2831_v61  ;;  %v2834_v1 = vld [vmem:[#allocation18 + $0x30] ss:$8 sps:$4 sm:$0xff]   ;;  %v2842_v6 = vld [vmem:[#allocation18 + $0x54] ss:$8 sps:$4 sm:$0xff]  }
 0xabf   : > { %v1513_v36 = vpop.permute.xlu1 %1512  ;;  %2628 = vmatpush3.bf16.msra.mxu0 %v2818_v31  ;;  %1876 = vmatprep.subr.bf16.mxu1 %v2836_v63  ;;  %v2839_v4 = vld [vmem:[#allocation18 + $0x44] ss:$8 sps:$4 sm:$0xff]   ;;  %v2854_v31 = vld [vmem:[#allocation20 + $0x10] sm:$0xff]  }
 0xac0   : > { %1430 = vst.msk [vmem:[#allocation5 + $0x10] sm:$0xff] %vm793_vm1, %v1429_v5  ;;  %2629 = vmatprep.subr.bf16.mxu0 %v3265_v0  ;;  %v1515_v27 = vmul.f32 %v1513_v36, %v1509_v23  ;;  %v2837_v5 = vld [vmem:[#allocation18 + $0x40] ss:$8 sps:$4 sm:$0xff]  }
 0xac1   : > { %v2849_v36 = vld [vmem:[#allocation20 + $0x40] sm:$0xff]   ;;  %v2860_v23 = vld [vmem:[#allocation20 + $0x28] sm:$0xff]  }
 0xac2   : > { %1877 = vmatpush1.bf16.msra.mxu1 %v2834_v1 }
 0xac3   : > { %v1578_v10 = vld [vmem:[#allocation5 + $0x8] sm:$0xff]  ;;  %2630 = vmatpush3.bf16.msra.mxu0 %v2819_v18  ;;  %1878 = vmatprep.subr.bf16.mxu1 %v2839_v4 }
 0xac4   : > { %v2886_v8 = vpop.eup %2885  ;;  %v1586_v13 = vmul.f32 %v1584_v11, %v1578_v10  ;;  %2631 = vmatprep.subr.bf16.mxu0 %v3265_v0  ;;  %v2845_v10 = vld [vmem:[#allocation18 + $0x64] ss:$8 sps:$4 sm:$0xff]   ;;  %v2848_v11 = vld [vmem:[#allocation18 + $0x74] ss:$8 sps:$4 sm:$0xff]  }
 0xac5   : > { %1601 = vperm.xlu1 %2790, %v2886_v8   ;;  %v2840_v8 = vld [vmem:[#allocation18 + $0x50] ss:$8 sps:$4 sm:$0xff]  }
 0xac6   : > { %1879 = vmatpush1.bf16.msra.mxu1 %v2837_v5  ;;  %v2855_v18 = vld [vmem:[#allocation20 + $0x58] sm:$0xff]   ;;  %v2434_v5 = vld [vmem:[%s4135_s8 + $0x4] ss:$0 sm:$0xff] }
 0xac7   : > { %v1587_v14 = vld [vmem:[#allocation5 + $0x10] sm:$0xff]  ;;  %2632 = vmatpush3.bf16.msra.mxu0 %v2820_v19  ;;  %1880 = vmatprep.subr.bf16.mxu1 %v2842_v6  ;;  %v2856_v19 = vld [vmem:[#allocation20 + $0x18] sm:$0xff]  }
 0xac8   : > { %v2888_v9 = vpop.eup %2887  ;;  %2633 = vmatprep.subr.bf16.mxu0 %v3265_v0 }
 0xac9   : > { %1111 = vperm.xlu1 %2790, %v2884_v53  }
 0xaca   : > { %1881 = vmatpush1.bf16.msra.mxu1 %v2840_v8  ;;  %v2435_v8 = vld [vmem:[%s4135_s8 + $0x5] ss:$0 sm:$0xff] }
 0xacb   : > { %2634 = vmatpush3.bf16.msra.mxu0 %v2821_v49  ;;  %1882 = vmatprep.subr.bf16.mxu1 %v2845_v10  ;;  %v2857_v49 = vld [vmem:[#allocation20 + $0x60] sm:$0xff]  }
 0xacc   : > { %2635 = vmatprep.subr.bf16.mxu0 %v3265_v0 }
 0xacd   : > { %1574 = vperm.xlu1 %2790, %v2888_v9   ;;  %v2843_v9 = vld [vmem:[#allocation18 + $0x60] ss:$8 sps:$4 sm:$0xff]  }
 0xace   : > { %1883 = vmatpush1.bf16.msra.mxu1 %v2843_v9 }
 0xacf   : > { %2636 = vmatpush3.bf16.msra.mxu0 %v2822_v20  ;;  %1884 = vmatprep.subr.bf16.mxu1 %v2848_v11  ;;  %v2858_v20 = vld [vmem:[#allocation20 + $0x20] sm:$0xff]  }
 0xad0   : > { %2637 = vmatprep.subr.bf16.mxu0 %v3265_v0 }
 0xad1   : > { %1606 = vrot.lane.b32.xlu1 %v1586_v13, %s3271_s19  ;;  %v2846_v13 = vld [vmem:[#allocation18 + $0x70] ss:$8 sps:$4 sm:$0xff]  }
 0xad2   : > { %1885 = vmatpush1.bf16.msra.mxu1 %v2846_v13 }
 0xad3   : > { %2638 = vmatpush3.bf16.msra.mxu0 %v2823_v21  ;;  %v2859_v21 = vld [vmem:[#allocation20 + $0x68] sm:$0xff]  }
 0xad4   : > { %2639 = vmatprep.subr.bf16.mxu0 %v3265_v0 }
 0xad7   : > { %v1593_v15 = vpop.permute.xlu1 %1592  ;;  %2640 = vmatpush3.bf16.msra.mxu0 %v2824_v30  ;;  %v2400_v30 = vld [vmem:[%s4135_s8 + $0x2] ss:$0 sm:$0xff] }
 0xad8   : > { %v1595_v17 = vmul.f32 %v1593_v15, %v1587_v14  ;;  %v2850_v14 = vld [vmem:[#allocation20] sm:$0xff]   ;;  %v2851_v15 = vld [vmem:[#allocation20 + $0x48] sm:$0xff]   ;;  %2495 = vmatprep.subr.bf16.mxu0 %v2849_v36 }
 0xada   : > { %1610 = vrot.lane.b32.xlu0 %v1595_v17, %s3270_s1  ;;  %v2853_v17 = vld [vmem:[#allocation20 + $0x50] sm:$0xff]   ;;  %s2125_s1 = sshll.u32 %s643_s30, 4  ;;  %s3997_s1 = int_to_ptr.vmem [resolvable:$true] %s2125_s1 }
 0xadb   : > { %s3152_s16 = scalar_lea.vmem %s3997_s1, 128  ;;  %p3159_p10 = scmp.lt.s32.totalorder %s3997_s1, %s3157_s17 }
 0xadc   : > { %p3153_p2 = scmp.ne.s32.totalorder %s3997_s1, %s3152_s16  ;;  %p3160_p6 = scmp.lt.s32.totalorder %s3158_s18, %s3152_s16 }
 0xade   : > { %p3154_p1 = pnand %p3153_p2, %p4139_p5  ;;  %p3161_p0 = por %p3160_p6, %p3159_p10 }
 0xae0   : > { %p3155_p9 = pneg %p3154_p1 }
 0xae2   : > { %p3162_p12 = pnand %p3161_p0, %p3155_p9 }
 0xaf6   : > { %v1557_v28 = vpop.f32.mrb[32].mxu1 }
 0xaf7   : > { %v1563_v22 = vadd.f32 %v1557_v28, %v1515_v27  ;;  %v2623_v25 = vpop.f32.mrb[33].mxu1 }
 0xaf8   : > { %v1560_v26 = vpop.f32.mrb[34].mxu1 }
 0xaf9   : > { %1564 = vst.msk [vmem:[#allocation5 + $0x18] sm:$0xff] %vm793_vm1, %v1563_v22  ;;  %v2624_v29 = vpop.f32.mrb[35].mxu1  ;;  %v2399_v26 = vld [vmem:[%s4135_s8 + $0x1] ss:$0 sm:$0xff] }
 0xb00   : > { %v1596_v33 = vld [vmem:[#allocation5 + $0x18] sm:$0xff] }
 0xb44   : > { %v1602_v32 = vpop.permute.xlu1 %1601 }
 0xb45   : > { %v1604_v34 = vmul.f32 %v1602_v32, %v1596_v33 }
 0xb47   : > { %1614 = vrot.lane.b32.xlu1 %v1604_v34, %s3267_s27  ;;  %v2893_v34 = vld [vmem:[%s545_s13] sm:$0xff] }
 0xb48   : > { %v1112_v37 = vpop.permute.xlu1 %1111 }
 0xb49   : > { %v1114_v59 = vmul.f32 %v1112_v37, %v1108_v35 }
 0xb4b   : > { %v1159_v0 = vadd.f32 %v3859_v12, %v1114_v59  ;;  %v2390_v12 = vld [vmem:[%s4135_s8] ss:$0 sm:$0xff]  ;;  %v2861_v59 = vld [vmem:[#allocation20 + $0x70] sm:$0xff]  }
 0xb4c   : > { %v1575_v39 = vpop.permute.xlu1 %1574  ;;  %v1611_v44 = vpop.permute.xlu0 %1610 }
 0xb4d   : > { %1160 = vst.msk [vmem:[#allocation5] sm:$0xff] %vm793_vm1, %v1159_v0  ;;  %v2862_v0 = vld [vmem:[#allocation20 + $0x30] sm:$0xff]  }
 0xb50   : > { %v1607_v42 = vpop.permute.xlu1 %1606 }
 0xb54   : > { %v1569_v38 = vld [vmem:[#allocation5] sm:$0xff] }
 0xb55   : > { %v1577_v40 = vmul.f32 %v1575_v39, %v1569_v38  ;;  %v2863_v38 = vld [vmem:[#allocation20 + $0x78] sm:$0xff]  }
 0xb56   : > { %v2864_v39 = vld [vmem:[#allocation20 + $0x38] sm:$0xff]  }
 0xb57   : > { %v1617_v43 = vsel %vm793_vm1, %v1577_v40, %v1607_v42  ;;  %v1778_v40 = vld [vmem:[%s4136_s25] sm:$0x3]  ;;  %v1786_v42 = vsub.s32 1, %v3813_v46  ;;  %v2417_v46 = vld [vmem:[%s4135_s8 + $0x3] ss:$0 sm:$0xff] }
 0xb58   : > { %v1619_v45 = vsel %vm1618_vm7, %v1617_v43, %v1611_v44  ;;  %v1783_v43 = vrot.slane %v1778_v40, %v1079_v47 }
 0xb59   : > { %v1787_v44 = vrot.slane %v1778_v40, %v1786_v42 }
 0xbb9   : > { %v1615_v41 = vpop.permute.xlu1 %1614 }
 0xbba   : > { %v1621_v7 = vsel %vm1620_vm8, %v1619_v45, %v1615_v41 }
 0xbbb   : > { %v1628_v48 = vpack.c.bf16 %v1621_v7, %v1621_v7 }
 0xbbd   : > { %2642 = vmatmul.mubr.bf16.vlgmr.msra.gmra.mrb[8].mxu0 %v1628_v48 }
 0xbbe   : > { %2496 = vmatpush3.bf16.msra.mxu0 %v2850_v14 }
 0xbbf   : > { %2497 = vmatprep.subr.bf16.mxu0 %v2851_v15 }
 0xbc2   : > { %2498 = vmatpush3.bf16.msra.mxu0 %v2852_v16 }
 0xbc3   : > { %2499 = vmatprep.subr.bf16.mxu0 %v2853_v17 }
 0xbc6   : > { %2500 = vmatpush3.bf16.msra.mxu0 %v2854_v31 }
 0xbc7   : > { %2501 = vmatprep.subr.bf16.mxu0 %v2855_v18 }
 0xbca   : > { %2502 = vmatpush3.bf16.msra.mxu0 %v2856_v19 }
 0xbcb   : > { %2503 = vmatprep.subr.bf16.mxu0 %v2857_v49 }
 0xbce   : > { %2504 = vmatpush3.bf16.msra.mxu0 %v2858_v20 }
 0xbcf   : > { %2505 = vmatprep.subr.bf16.mxu0 %v2859_v21 }
 0xbd2   : > { %2506 = vmatpush3.bf16.msra.mxu0 %v2860_v23 }
 0xbd3   : > { %2507 = vmatprep.subr.bf16.mxu0 %v2861_v59 }
 0xbd6   : > { %2508 = vmatpush3.bf16.msra.mxu0 %v2862_v0 }
 0xbd7   : > { %2509 = vmatprep.subr.bf16.mxu0 %v2863_v38 }
 0xbda   : > { %2510 = vmatpush3.bf16.msra.mxu0 %v2864_v39 }
 0xc90   : > { %v1731_v50 = vpop.f32.mrb[8].mxu0 }
 0xc91   : > { %v1732_v51 = vadd.f32 %v2390_v12, %v1731_v50  ;;  %v2643_v52 = vpop.f32.mrb[9].mxu0 }
 0xc92   : > { %v1734_v53 = vpop.f32.mrb[10].mxu0 }
 0xc93   : > { %1738 = vadd.xlane.f32.xlu0 %v1732_v51  ;;  %v2644_v54 = vpop.f32.mrb[11].mxu0 }
 0xd20   : > { %v1739_v60 = vpop.xlane.xlu0 %1738 }
 0xd21   : > { %v1741_v62 = vmul.f32 0.0078125, %v1739_v60 }
 0xd23   : > { %v1742_v2 = vsub.f32 %v1732_v51, %v1741_v62 }
 0xd25   : > { %v1743_v3 = vmul.f32 %v1742_v2, %v1742_v2 }
 0xd27   : > { %1744 = vadd.xlane.f32.xlu1 %v1743_v3 }
 0xdb4   : > { %v1745_v27 = vpop.xlane.xlu1 %1744 }
 0xdb5   : > { %v1746_v28 = vmul.f32 0.0078125, %v1745_v27 }
 0xdb7   : > { %v1747_v22 = vadd.f32 1e-05, %v1746_v28 }
 0xdb9   : > { %2889 = vrsqrt.f32 %v1747_v22 }
 0xdc3   : > { %v2890_v25 = vpop.eup %2889 }
 0xdc4   : > { %v1749_v29 = vmul.f32 %v2890_v25, %v1742_v2 }
 0xdc6   : > { %v1754_v32 = vmul.f32 %v2399_v26, %v1749_v29 }
 0xdc8   : > { %v1759_v33 = vadd.f32 %v2400_v30, %v1754_v32 }
 0xdca   : > { %v1760_v35 = vadd.f32 %v2893_v34, %v1759_v33 }
 0xdcc   : > { %v1761_v37 = vpack.c.bf16 %v1760_v35, %v1760_v35 }
 0xdce   : > { %1903 = vmatmul.mubr.bf16.vlgmr.msra.gmra.mrb[36].mxu1 %v1761_v37 }
 0xea1   : > { %v1904_v45 = vpop.f32.mrb[36].mxu1 }
 0xea2   : > { %v1905_v41 = vadd.f32 %v1904_v45, %v1783_v43  ;;  %v1906_v7 = vpop.f32.mrb[37].mxu1 }
 0xea3   : > { %v1907_v48 = vadd.f32 %v1906_v7, %v1787_v44  ;;  %v1908_v12 = vpop.f32.mrb[38].mxu1 }
 0xea4   : > { %v1911_v50 = vmax.f32 %v1905_v41, 0.0  ;;  %v1909_v51 = vpop.f32.mrb[39].mxu1 }
 0xea5   : > { %v1912_v52 = vmax.f32 %v1907_v48, 0.0 }
 0xea6   : > { %v1913_v54 = vpack.c.bf16 %v1911_v50, %v1911_v50 }
 0xea7   : > { %v1914_v53 = vpack.c.bf16 %v1912_v52, %v1912_v52 }
 0xea9   : > { %2079 = vmatprep.mubr.bf16.mxu0 %v1914_v53 }
 0xeaa   : > { %2080 = vmatmul.mubr.bf16.vlgmr.msra.gmra.mrb[12].mxu0 %v1913_v54 }
 0xf7d   : > { %v2511_v55 = vpop.f32.mrb[12].mxu0 }
 0xf7e   : > { %v2512_v56 = vpop.f32.mrb[13].mxu0 }
 0xf7f   : > { %v2513_v47 = vadd.f32 %v2512_v56, %v2511_v55  ;;  %v2514_v57 = vpop.f32.mrb[14].mxu0 }
 0xf80   : > { %v2515_v58 = vpop.f32.mrb[15].mxu0 }
 0xf81   : > { %v2082_v60 = vadd.f32 %v2513_v47, %v2417_v46 }
 0xf83   : > { %2087 = vadd.xlane.f32.xlu0 %v2082_v60 }
0x1010   : > { %v2088_v62 = vpop.xlane.xlu0 %2087 }
0x1011   : > { %v2089_v2 = vmul.f32 0.0078125, %v2088_v62 }
0x1013   : > { %v2090_v3 = vsub.f32 %v2082_v60, %v2089_v2 }
0x1015   : > { %v2091_v24 = vmul.f32 %v2090_v3, %v2090_v3 }
0x1017   : > { %2092 = vadd.xlane.f32.xlu0 %v2091_v24 }
0x10a4   : > { %v2093_v61 = vpop.xlane.xlu0 %2092 }
0x10a5   : > { %v2094_v63 = vmul.f32 0.0078125, %v2093_v61 }
0x10a7   : > { %v2095_v1 = vadd.f32 1e-05, %v2094_v63 }
0x10a9   : > { %2891 = vrsqrt.f32 %v2095_v1 }
0x10b3   : > { %v2892_v4 = vpop.eup %2891 }
0x10b4   : > { %v2097_v6 = vmul.f32 %v2892_v4, %v2090_v3 }
0x10b6   : > { %v2102_v9 = vmul.f32 %v2434_v5, %v2097_v6 }
0x10b8   : > { %v2107_v10 = vadd.f32 %v2435_v8, %v2102_v9 }
0x10ba   : > { %v2108_v11 = vadd.f32 %v2107_v10, %v1760_v35 }
0x10bc   : > { %2109 = vst [vmem:[%s643_s30] sm:$0xff] %v2108_v11 }
0x10bd   : > { %3165 = shalt.err (!%p3162_p12)
}
0x10be   : > { %s3166_s24 = scalar_lea.hbm %s3995_s12, 128  ;;  %s3170_s25 = scalar_lea.hbm %s4138_s10, 256 }
0x10bf   : > { %p3167_p11 = scmp.ne.s32.totalorder %s3995_s12, %s3166_s24  ;;  %p3171_p7 = scmp.lt.u32.totalorder %s3995_s12, %s4138_s10 }
0x10c0   : > { %p3172_p8 = scmp.lt.u32.totalorder %s3170_s25, %s3166_s24  ;;  %p3174_p2 = scmp.lt.u32.totalorder %s3166_s24, %s3995_s12 }
0x10c1   : > { %p3168_p13 = pnand %p3167_p11, %p4139_p5 }
0x10c2   : > { %p3173_p3 = por %p3172_p8, %p3171_p7 }
0x10c3   : > { %p3169_p4 = pneg %p3168_p13 }
0x10c4   : > { %p3175_p1 = por %p3174_p2, %p3173_p3 }
0x10c6   : > { %p3176_p9 = pnand %p3175_p1, %p3169_p4 }
0x10c8   : > { %3179 = shalt.err (!%p3176_p9)
}
0x10c9   : > { %2675 = dma.vmem_to_hbm [thread:$0]  (%p4139_p5), %s3997_s1, 128, %s3995_s12, %s2111_s4  }
0x10ca PF: > { %s4140_s3 = sld [smem:[#allocation28_spill]]  ;;  %s4141_s27 = sld [smem:[#allocation36_spill]] }
0x10cb   : > { %s4142_s14 = sld [smem:[#allocation31_spill]] }
0x10d0   : > { %s2137_s15 = sand.u32 1, %s4140_s3   ;;  %p4143_p10 = scmp.ne.s32.totalorder %s4141_s27, 0 }
0x10d1   : > { %p4144_p6 = scmp.ge.s32.totalorder %s4142_s14, 2  ;;  %s2138_s29 = scalar_lea.sflag [#allocation8], %s2137_s15 }
0x10d3   : > { %p2707_p0 = pnand %p4144_p6, %p4143_p10 }
0x10d5   : > { %3225 = dma.done.wait (!%p2707_p0), %s2138_s29, 128  }
0x10d6   : > { %3227 = vsyncadd (!%p2707_p0), %s2138_s29, 4294967168  ;;  %s34_s26 = sadd.s32 1, %s4142_s14   ;;  %s4145_s30 = sld [smem:[#allocation35_spill]] }
0x10d7   : > { %p31_p12 = scmp.ge.s32.totalorder %s34_s26, 4   ;;  %s4146_s24 = sld [smem:[#allocation30_spill]] }
0x10d8   : > { %s4147_s25 = sld [smem:[#allocation33_spill]]  ;;  %s4148_s21 = smov %s3234_s22 }
0x10d9   : > { %s4149_s22 = smov %s3238_s23  ;;  %33 = sbr.rel (!%p31_p12) target bundleno = 20 (0x14), region = 187 }
0x10dc   : > { %s4150_s23 = smov %s4145_s30 }
0x10e0   :  { %2143 = vsyncpa [#allocation7], 1 }
0x10e1   :  { %2145 = vsyncpa [#allocation7 + $0x1], 1 }
0x10e2   :  { %2146 = vsyncpa [#allocation10], 1 }
0x10e3   :  { %2148 = vsyncpa [#allocation10 + $0x1], 1 }
0x10e4   :  { %2149 = vsyncpa [#allocation13], 1 }
0x10e5   :  { %2150 = vsyncpa [#allocation16], 1 }
0x10e6   :  { %2151 = vsyncpa [#allocation19], 1 }
0x10e7   :  { %2152 = vsyncpa [#allocation8], 1 }
0x10e8   :  { %2154 = vsyncpa [#allocation8 + $0x1], 1 }

</bundles_post_ra>
